<compile_context>
chip_gen: v6e
topology: v6e:2x2x1
jax: 0.10.0
libtpu: 0.0.40
codegen_flags: <defaults>
</compile_context>

<pallas_src>
import jax
import jax.numpy as jnp
from jax import lax
from jax.experimental import pallas as pl
from jax.experimental.pallas import tpu as pltpu


def _layernorm(z, w, b, eps=1e-5):
    mu = jnp.mean(z, axis=-1, keepdims=True)
    var = jnp.mean((z - mu) ** 2, axis=-1, keepdims=True)
    return (z - mu) * lax.rsqrt(var + eps) * w + b


def block_kernel(x_ref, xprev_ref, params_ref, waa_ref, wbb_ref, wv_ref, o_ref,
                 xa_sc, xb_sc, acc_sc):
    m = pl.program_id(1)
    f = pl.program_id(2)
    nf = pl.num_programs(2)
    _, tm, C = x_ref.shape

    # ---- prologue: once per (batch, M-tile); all F-tiles reuse the scratch ----
    @pl.when(f == 0)
    def _():
        x = x_ref[0]                                   # (TM, C) f32
        ln0w = params_ref[0:1, :]
        ln0b = params_ref[1:2, :]
        ln2w = params_ref[2:3, :]
        ln2b = params_ref[3:4, :]
        tmk = params_ref[4:5, :]
        tmr = params_ref[5:6, :]

        # ln0 (layer_id == 0)
        h = _layernorm(x, ln0w, ln0b)

        # TODO(synk): self.att (RWKV_Tmix_x060 / RWKV_TimeMix_RWKV5) source not
        # provided; the attention residual branch (and its ln1) is omitted rather
        # than faked.

        ln2h = _layernorm(h, ln2w, ln2b)

        # time_shift = ZeroPad2d((0,0,1,-1)): xx[t] = ln2h[t-1]; row 0 of this
        # tile comes from the last row of the previous T-tile of the same batch
        # element (re-normalized from raw x), and is zero for the first tile.
        prev_blk = xprev_ref[0]                        # (8, C) raw x rows
        prev = _layernorm(_layernorm(prev_blk[7:8, :], ln0w, ln0b), ln2w, ln2b)
        first = prev * (m > 0).astype(jnp.float32)     # (1, C); zero at tile 0

        # fused mix on the rolled tile:  x*k + xx*(1-k) == xx + (x - xx)*k
        rolled = pltpu.roll(ln2h, shift=1, axis=0)     # row t <- row t-1 (wraps)
        d = ln2h - rolled
        xa_sc[...] = (rolled + d * tmk).astype(jnp.bfloat16)
        xb_sc[...] = (rolled + d * tmr).astype(jnp.bfloat16)
        # fix only row 0 (1-row store instead of a full-tile iota + select)
        d0 = ln2h[0:1, :] - first
        xa_sc[0:1, :] = (first + d0 * tmk).astype(jnp.bfloat16)
        xb_sc[0:1, :] = (first + d0 * tmr).astype(jnp.bfloat16)

        # residual folded into the accumulator (saves h scratch + a VPU add)
        acc_sc[...] = h

    # ---- per F-tile MXU work (bf16 operands, f32 accumulation) ----
    a = jnp.dot(xa_sc[...], waa_ref[...], preferred_element_type=jnp.float32)
    b = jnp.dot(xb_sc[...], wbb_ref[...], preferred_element_type=jnp.float32)
    # mish(b) = b * tanh(softplus(b)) = b * (1 - 2 / ((1 + e^b)^2 + 1))
    # one exp + one approx reciprocal (EUP) instead of exp/log1p/tanh.
    # Clamp the exp argument: for b >= 20 the factor is 1.0 within f32 anyway,
    # and (1+e^20)^2 stays well inside f32 range.
    t = 1.0 + jnp.exp(jnp.minimum(b, 20.0))
    mish_b = b * (1.0 - 2.0 * pl.reciprocal(t * t + 1.0, approx=True))
    acc_sc[...] += jnp.dot((a * mish_b).astype(jnp.bfloat16), wv_ref[...],
                           preferred_element_type=jnp.float32)

    # ---- epilogue: single lane-dense store per (batch, M-tile) ----
    @pl.when(f == nf - 1)
    def _():
        o_ref[0] = acc_sc[...].astype(o_ref.dtype)


def block_forward(x, ln0w, ln0b, ln2w, ln2b, tmk, tmr, waa_t, wbb_t, wv_t,
                  *, tm=256, tf=256, out_dtype=jnp.bfloat16,
                  vmem_limit_bytes=64 * 1024 * 1024):
    """MishGLU-Block forward.

    Tiling guidance (weights are re-streamed once per (b, m) tile, reuse ~2*tm
    flops/byte):
      v5e:  tm>=256, tf=128 (4x128^2 MXU), default vmem limit ok.
      v6e:  tm=384-512, tf=256-512, vmem_limit_bytes up to ~96 MiB.
      v7x:  tm=256, tf=256-512, keep vmem_limit_bytes <= ~48-64 MiB (64 MiB/TC).
    """
    B, T, C = x.shape
    F = waa_t.shape[1]
    assert C % 128 == 0 and F % 128 == 0, "pad n_embd / dim_ffn to multiples of 128"
    assert T % tm == 0 and tm % 8 == 0 and F % tf == 0
    mt, ft = T // tm, F // tf
    sub = tm // 8                                      # prev-row carrier: 8-row blocks

    # Pack the six (1,C) parameter vectors into one sublane-aligned (8,C) block
    # -> one DMA descriptor / one VMEM block instead of six padded ones.
    rows = [jnp.reshape(p, (1, C)).astype(jnp.float32)
            for p in (ln0w, ln0b, ln2w, ln2b, tmk, tmr)]
    params = jnp.pad(jnp.concatenate(rows, axis=0), ((0, 2), (0, 0)))   # (8, C)

    grid_spec = pltpu.PrefetchScalarGridSpec(
        num_scalar_prefetch=0,
        grid=(B, mt, ft),
        in_specs=[
            pl.BlockSpec((1, tm, C), lambda b, m, f: (b, m, 0)),            # x tile
            # 8-row carrier containing the last row of the previous T-tile
            pl.BlockSpec((1, 8, C),
                         lambda b, m, f: (b, jnp.maximum(m * sub - 1, 0), 0)),
            pl.BlockSpec((8, C), lambda b, m, f: (0, 0)),                   # packed params
            pl.BlockSpec((C, tf), lambda b, m, f: (0, f)),                  # aa.T slice (bf16)
            pl.BlockSpec((C, tf), lambda b, m, f: (0, f)),                  # bb.T slice (bf16)
            pl.BlockSpec((tf, C), lambda b, m, f: (f, 0)),                  # value.T slice (bf16)
        ],
        out_specs=pl.BlockSpec((1, tm, C), lambda b, m, f: (b, m, 0)),
        scratch_shapes=[
            pltpu.VMEM((tm, C), jnp.bfloat16),   # xa (bf16 matmul LHS)
            pltpu.VMEM((tm, C), jnp.bfloat16),   # xb
            pltpu.VMEM((tm, C), jnp.float32),    # f32 accumulator (residual folded in)
        ],
    )
    return pl.pallas_call(
        block_kernel,
        out_shape=jax.ShapeDtypeStruct((B, T, C), out_dtype),
        grid_spec=grid_spec,
        compiler_params=pltpu.CompilerParams(
            dimension_semantics=("parallel", "parallel", "arbitrary"),
            vmem_limit_bytes=vmem_limit_bytes),
    )(x, x, params, waa_t, wbb_t, wv_t)


def reference_forward(x, ln0w, ln0b, ln2w, ln2b, tmk, tmr, waa_t, wbb_t, wv_t):
    h = _layernorm(x, ln0w, ln0b)
    ln2h = _layernorm(h, ln2w, ln2b)
    xx = jnp.concatenate([jnp.zeros_like(ln2h[:, :1]), ln2h[:, :-1]], axis=1)
    xa = ln2h * tmk + xx * (1.0 - tmk)
    xb = ln2h * tmr + xx * (1.0 - tmr)
    a = xa @ waa_t
    b = xb @ wbb_t
    mish_b = b * jnp.tanh(jax.nn.softplus(b))
    return h + (a * mish_b) @ wv_t


if __name__ == "__main__":
    # B, ctx_len, n_embd, dim_ffn — lane-dense (x128) and large enough to exercise
    # both the T-tiling (2 M-tiles -> cross-tile time_shift) and the F reduction
    # (2 F-tiles -> accumulator path), while staying small.
    B, T, C, F = 2, 256, 128, 256
    layer_id, n_layer = 0, 4

    key = jax.random.PRNGKey(0)
    kx, k1, k2, k3 = jax.random.split(key, 4)

    x = jax.random.normal(kx, (B, T, C), dtype=jnp.float32)

    # LayerNorm params (PyTorch default init: weight=1, bias=0)
    ln0w = jnp.ones((1, C), jnp.float32)
    ln0b = jnp.zeros((1, C), jnp.float32)
    ln2w = jnp.ones((1, C), jnp.float32)
    ln2b = jnp.zeros((1, C), jnp.float32)

    # MishGLU time-mix params: (i / n_embd) ** (1 - layer_id / n_layer)
    ratio_1_to_almost0 = 1.0 - layer_id / n_layer
    ramp = (jnp.arange(C, dtype=jnp.float32) / C) ** ratio_1_to_almost0
    tmk = ramp.reshape(1, C)
    tmr = ramp.reshape(1, C)

    # Linear weights (PyTorch layout (out, in)); pass pre-transposed (in, out), bf16 for MXU.
    waa = 0.02 * jax.random.normal(k1, (F, C), dtype=jnp.float32)
    wbb = 0.02 * jax.random.normal(k2, (F, C), dtype=jnp.float32)
    wv = 0.02 * jax.random.normal(k3, (C, F), dtype=jnp.float32)
    waa_t = waa.T.astype(jnp.bfloat16)     # (C, F)
    wbb_t = wbb.T.astype(jnp.bfloat16)     # (C, F)
    wv_t = wv.T.astype(jnp.bfloat16)       # (F, C)

    # Small shapes: use tm=128 / tf=128 so both the cross-tile time_shift carrier
    # and the F-axis accumulator are exercised (production defaults are larger).
    out = block_forward(x, ln0w, ln0b, ln2w, ln2b, tmk, tmr, waa_t, wbb_t, wv_t,
                        tm=128, tf=128)
    out = jax.block_until_ready(out)

    ref = reference_forward(x, ln0w, ln0b, ln2w, ln2b, tmk, tmr,
                            waa_t.astype(jnp.float32),
                            wbb_t.astype(jnp.float32),
                            wv_t.astype(jnp.float32))
    assert out.shape == (B, T, C)
    # bf16 matmul operands + bf16 output + approx-reciprocal mish -> loose tolerance
    err = float(jnp.max(jnp.abs(out.astype(jnp.float32) - ref)))
    assert jnp.allclose(out.astype(jnp.float32), ref, atol=5e-2, rtol=5e-2), err

    print("KERNEL_OK")
</pallas_src>

<mosaic_0001>
module attributes {stable_mosaic.version = 11 : i64} {
  func.func @block_kernel(%arg0: i32, %arg1: i32, %arg2: i32, %arg3: memref<1x128x128xf32, #tpu.memory_space<vmem>>, %arg4: memref<1x8x128xf32, #tpu.memory_space<vmem>>, %arg5: memref<8x128xf32, #tpu.memory_space<vmem>>, %arg6: memref<128x128xbf16, #tpu.memory_space<vmem>>, %arg7: memref<128x128xbf16, #tpu.memory_space<vmem>>, %arg8: memref<128x128xbf16, #tpu.memory_space<vmem>>, %arg9: memref<1x128x128xbf16, #tpu.memory_space<vmem>>, %arg10: memref<128x128xbf16, #tpu.memory_space<vmem>>, %arg11: memref<128x128xbf16, #tpu.memory_space<vmem>>, %arg12: memref<128x128xf32, #tpu.memory_space<vmem>>) attributes {dimension_semantics = [#tpu.dimension_semantics<parallel>, #tpu.dimension_semantics<parallel>, #tpu.dimension_semantics<arbitrary>], iteration_bounds = array<i64: 2, 2, 2>, scalar_prefetch = 0 : i64, scratch_operands = 3 : i64, tpu.core_type = #tpu.core_type<tc>, window_params = [{transform_indices = @transform_0, window_bounds = array<i64: 1, 128, 128>}, {transform_indices = @transform_1, window_bounds = array<i64: 1, 8, 128>}, {pipeline_mode = #tpu.pipeline_mode<synchronous>, transform_indices = @transform_2, window_bounds = array<i64: 8, 128>}, {transform_indices = @transform_3, window_bounds = array<i64: 128, 128>}, {transform_indices = @transform_4, window_bounds = array<i64: 128, 128>}, {transform_indices = @transform_5, window_bounds = array<i64: 128, 128>}, {transform_indices = @transform_6, window_bounds = array<i64: 1, 128, 128>}]} {
    %c0_i32 = arith.constant 0 : i32
    %0 = arith.cmpi eq, %arg2, %c0_i32 : i32
    %1 = arith.extui %0 : i1 to i32
    %c0_i32_0 = arith.constant 0 : i32
    %2 = arith.cmpi ne, %1, %c0_i32_0 : i32
    scf.if %2 {
      %c0_22 = arith.constant 0 : index
      %c0_23 = arith.constant 0 : index
      %c0_24 = arith.constant 0 : index
      %33 = vector.load %arg3[%c0_22, %c0_23, %c0_24] : memref<1x128x128xf32, #tpu.memory_space<vmem>>, vector<1x128x128xf32>
      %34 = vector.shape_cast %33 : vector<1x128x128xf32> to vector<128x128xf32>
      %c0_25 = arith.constant 0 : index
      %c0_26 = arith.constant 0 : index
      %35 = vector.load %arg5[%c0_25, %c0_26] : memref<8x128xf32, #tpu.memory_space<vmem>>, vector<1x128xf32>
      %c1 = arith.constant 1 : index
      %c0_27 = arith.constant 0 : index
      %36 = vector.load %arg5[%c1, %c0_27] : memref<8x128xf32, #tpu.memory_space<vmem>>, vector<1x128xf32>
      %c2 = arith.constant 2 : index
      %c0_28 = arith.constant 0 : index
      %37 = vector.load %arg5[%c2, %c0_28] : memref<8x128xf32, #tpu.memory_space<vmem>>, vector<1x128xf32>
      %c3 = arith.constant 3 : index
      %c0_29 = arith.constant 0 : index
      %38 = vector.load %arg5[%c3, %c0_29] : memref<8x128xf32, #tpu.memory_space<vmem>>, vector<1x128xf32>
      %c4 = arith.constant 4 : index
      %c0_30 = arith.constant 0 : index
      %39 = vector.load %arg5[%c4, %c0_30] : memref<8x128xf32, #tpu.memory_space<vmem>>, vector<1x128xf32>
      %c5 = arith.constant 5 : index
      %c0_31 = arith.constant 0 : index
      %40 = vector.load %arg5[%c5, %c0_31] : memref<8x128xf32, #tpu.memory_space<vmem>>, vector<1x128xf32>
      %cst_32 = arith.constant dense<0.000000e+00> : vector<128xf32>
      %41 = vector.multi_reduction <add>, %34, %cst_32 [1] : vector<128x128xf32> to vector<128xf32>
      %42 = vector.shape_cast %41 : vector<128xf32> to vector<128x1xf32>
      %cst_33 = arith.constant 1.280000e+02 : f32
      %43 = vector.broadcast %cst_33 : f32 to vector<128x1xf32>
      %44 = arith.divf %42, %43 : vector<128x1xf32>
      %45 = vector.broadcast %44 : vector<128x1xf32> to vector<128x128xf32>
      %46 = arith.subf %34, %45 : vector<128x128xf32>
      %47 = arith.mulf %46, %46 : vector<128x128xf32>
      %cst_34 = arith.constant dense<0.000000e+00> : vector<128xf32>
      %48 = vector.multi_reduction <add>, %47, %cst_34 [1] : vector<128x128xf32> to vector<128xf32>
      %49 = vector.shape_cast %48 : vector<128xf32> to vector<128x1xf32>
      %cst_35 = arith.constant 1.280000e+02 : f32
      %50 = vector.broadcast %cst_35 : f32 to vector<128x1xf32>
      %51 = arith.divf %49, %50 : vector<128x1xf32>
      %52 = vector.broadcast %44 : vector<128x1xf32> to vector<128x128xf32>
      %53 = arith.subf %34, %52 : vector<128x128xf32>
      %cst_36 = arith.constant 9.99999974E-6 : f32
      %54 = vector.broadcast %cst_36 : f32 to vector<128x1xf32>
      %55 = arith.addf %51, %54 : vector<128x1xf32>
      %56 = math.rsqrt %55 : vector<128x1xf32>
      %57 = vector.broadcast %56 : vector<128x1xf32> to vector<128x128xf32>
      %58 = arith.mulf %53, %57 : vector<128x128xf32>
      %59 = vector.broadcast %35 : vector<1x128xf32> to vector<128x128xf32>
      %60 = arith.mulf %58, %59 : vector<128x128xf32>
      %61 = vector.broadcast %36 : vector<1x128xf32> to vector<128x128xf32>
      %62 = arith.addf %60, %61 : vector<128x128xf32>
      %cst_37 = arith.constant dense<0.000000e+00> : vector<128xf32>
      %63 = vector.multi_reduction <add>, %62, %cst_37 [1] : vector<128x128xf32> to vector<128xf32>
      %64 = vector.shape_cast %63 : vector<128xf32> to vector<128x1xf32>
      %cst_38 = arith.constant 1.280000e+02 : f32
      %65 = vector.broadcast %cst_38 : f32 to vector<128x1xf32>
      %66 = arith.divf %64, %65 : vector<128x1xf32>
      %67 = vector.broadcast %66 : vector<128x1xf32> to vector<128x128xf32>
      %68 = arith.subf %62, %67 : vector<128x128xf32>
      %69 = arith.mulf %68, %68 : vector<128x128xf32>
      %cst_39 = arith.constant dense<0.000000e+00> : vector<128xf32>
      %70 = vector.multi_reduction <add>, %69, %cst_39 [1] : vector<128x128xf32> to vector<128xf32>
      %71 = vector.shape_cast %70 : vector<128xf32> to vector<128x1xf32>
      %cst_40 = arith.constant 1.280000e+02 : f32
      %72 = vector.broadcast %cst_40 : f32 to vector<128x1xf32>
      %73 = arith.divf %71, %72 : vector<128x1xf32>
      %74 = vector.broadcast %66 : vector<128x1xf32> to vector<128x128xf32>
      %75 = arith.subf %62, %74 : vector<128x128xf32>
      %cst_41 = arith.constant 9.99999974E-6 : f32
      %76 = vector.broadcast %cst_41 : f32 to vector<128x1xf32>
      %77 = arith.addf %73, %76 : vector<128x1xf32>
      %78 = math.rsqrt %77 : vector<128x1xf32>
      %79 = vector.broadcast %78 : vector<128x1xf32> to vector<128x128xf32>
      %80 = arith.mulf %75, %79 : vector<128x128xf32>
      %81 = vector.broadcast %37 : vector<1x128xf32> to vector<128x128xf32>
      %82 = arith.mulf %80, %81 : vector<128x128xf32>
      %83 = vector.broadcast %38 : vector<1x128xf32> to vector<128x128xf32>
      %84 = arith.addf %82, %83 : vector<128x128xf32>
      %c0_42 = arith.constant 0 : index
      %c0_43 = arith.constant 0 : index
      %c0_44 = arith.constant 0 : index
      %85 = vector.load %arg4[%c0_42, %c0_43, %c0_44] : memref<1x8x128xf32, #tpu.memory_space<vmem>>, vector<1x8x128xf32>
      %86 = vector.shape_cast %85 : vector<1x8x128xf32> to vector<8x128xf32>
      %87 = vector.extract_strided_slice %86 {offsets = [7, 0], sizes = [1, 128], strides = [1, 1]} : vector<8x128xf32> to vector<1x128xf32>
      %cst_45 = arith.constant dense<0.000000e+00> : vector<1xf32>
      %88 = vector.multi_reduction <add>, %87, %cst_45 [1] : vector<1x128xf32> to vector<1xf32>
      %89 = vector.shape_cast %88 : vector<1xf32> to vector<1x1xf32>
      %cst_46 = arith.constant 1.280000e+02 : f32
      %90 = vector.broadcast %cst_46 : f32 to vector<1x1xf32>
      %91 = arith.divf %89, %90 : vector<1x1xf32>
      %92 = vector.broadcast %91 : vector<1x1xf32> to vector<1x128xf32>
      %93 = arith.subf %87, %92 : vector<1x128xf32>
      %94 = arith.mulf %93, %93 : vector<1x128xf32>
      %cst_47 = arith.constant dense<0.000000e+00> : vector<1xf32>
      %95 = vector.multi_reduction <add>, %94, %cst_47 [1] : vector<1x128xf32> to vector<1xf32>
      %96 = vector.shape_cast %95 : vector<1xf32> to vector<1x1xf32>
      %cst_48 = arith.constant 1.280000e+02 : f32
      %97 = vector.broadcast %cst_48 : f32 to vector<1x1xf32>
      %98 = arith.divf %96, %97 : vector<1x1xf32>
      %99 = vector.broadcast %91 : vector<1x1xf32> to vector<1x128xf32>
      %100 = arith.subf %87, %99 : vector<1x128xf32>
      %cst_49 = arith.constant 9.99999974E-6 : f32
      %101 = vector.broadcast %cst_49 : f32 to vector<1x1xf32>
      %102 = arith.addf %98, %101 : vector<1x1xf32>
      %103 = math.rsqrt %102 : vector<1x1xf32>
      %104 = vector.broadcast %103 : vector<1x1xf32> to vector<1x128xf32>
      %105 = arith.mulf %100, %104 : vector<1x128xf32>
      %106 = arith.mulf %105, %35 : vector<1x128xf32>
      %107 = arith.addf %106, %36 : vector<1x128xf32>
      %cst_50 = arith.constant dense<0.000000e+00> : vector<1xf32>
      %108 = vector.multi_reduction <add>, %107, %cst_50 [1] : vector<1x128xf32> to vector<1xf32>
      %109 = vector.shape_cast %108 : vector<1xf32> to vector<1x1xf32>
      %cst_51 = arith.constant 1.280000e+02 : f32
      %110 = vector.broadcast %cst_51 : f32 to vector<1x1xf32>
      %111 = arith.divf %109, %110 : vector<1x1xf32>
      %112 = vector.broadcast %111 : vector<1x1xf32> to vector<1x128xf32>
      %113 = arith.subf %107, %112 : vector<1x128xf32>
      %114 = arith.mulf %113, %113 : vector<1x128xf32>
      %cst_52 = arith.constant dense<0.000000e+00> : vector<1xf32>
      %115 = vector.multi_reduction <add>, %114, %cst_52 [1] : vector<1x128xf32> to vector<1xf32>
      %116 = vector.shape_cast %115 : vector<1xf32> to vector<1x1xf32>
      %cst_53 = arith.constant 1.280000e+02 : f32
      %117 = vector.broadcast %cst_53 : f32 to vector<1x1xf32>
      %118 = arith.divf %116, %117 : vector<1x1xf32>
      %119 = vector.broadcast %111 : vector<1x1xf32> to vector<1x128xf32>
      %120 = arith.subf %107, %119 : vector<1x128xf32>
      %cst_54 = arith.constant 9.99999974E-6 : f32
      %121 = vector.broadcast %cst_54 : f32 to vector<1x1xf32>
      %122 = arith.addf %118, %121 : vector<1x1xf32>
      %123 = math.rsqrt %122 : vector<1x1xf32>
      %124 = vector.broadcast %123 : vector<1x1xf32> to vector<1x128xf32>
      %125 = arith.mulf %120, %124 : vector<1x128xf32>
      %126 = arith.mulf %125, %37 : vector<1x128xf32>
      %127 = arith.addf %126, %38 : vector<1x128xf32>
      %c0_i32_55 = arith.constant 0 : i32
      %128 = arith.cmpi sgt, %arg1, %c0_i32_55 : i32
      %129 = arith.extui %128 : i1 to i32
      %130 = arith.sitofp %129 : i32 to f32
      %131 = vector.broadcast %130 : f32 to vector<1x128xf32>
      %132 = arith.mulf %127, %131 : vector<1x128xf32>
      %c1_i32_56 = arith.constant 1 : i32
      %133 = tpu.dynamic_rotate %84 by %c1_i32_56 dim 0 : vector<128x128xf32>, i32 -> vector<128x128xf32>
      %134 = arith.subf %84, %133 : vector<128x128xf32>
      %135 = vector.broadcast %39 : vector<1x128xf32> to vector<128x128xf32>
      %136 = arith.mulf %134, %135 : vector<128x128xf32>
      %137 = arith.addf %133, %136 : vector<128x128xf32>
      %138 = arith.truncf %137 : vector<128x128xf32> to vector<128x128xbf16>
      %c0_57 = arith.constant 0 : index
      %c0_58 = arith.constant 0 : index
      %139 = vector.load %arg10[%c0_57, %c0_58] : memref<128x128xbf16, #tpu.memory_space<vmem>>, vector<128x128xbf16>
      tpu.vector_store %arg10[%c0_57, %c0_58], %138 {strides = array<i32>} : memref<128x128xbf16, #tpu.memory_space<vmem>>, vector<128x128xbf16>,
      %140 = vector.broadcast %40 : vector<1x128xf32> to vector<128x128xf32>
      %141 = arith.mulf %134, %140 : vector<128x128xf32>
      %142 = arith.addf %133, %141 : vector<128x128xf32>
      %143 = arith.truncf %142 : vector<128x128xf32> to vector<128x128xbf16>
      %c0_59 = arith.constant 0 : index
      %c0_60 = arith.constant 0 : index
      %144 = vector.load %arg11[%c0_59, %c0_60] : memref<128x128xbf16, #tpu.memory_space<vmem>>, vector<128x128xbf16>
      tpu.vector_store %arg11[%c0_59, %c0_60], %143 {strides = array<i32>} : memref<128x128xbf16, #tpu.memory_space<vmem>>, vector<128x128xbf16>,
      %145 = vector.extract_strided_slice %84 {offsets = [0, 0], sizes = [1, 128], strides = [1, 1]} : vector<128x128xf32> to vector<1x128xf32>
      %146 = arith.subf %145, %132 : vector<1x128xf32>
      %147 = arith.mulf %146, %39 : vector<1x128xf32>
      %148 = arith.addf %132, %147 : vector<1x128xf32>
      %149 = arith.truncf %148 : vector<1x128xf32> to vector<1x128xbf16>
      %c0_61 = arith.constant 0 : index
      %c0_62 = arith.constant 0 : index
      %150 = vector.load %arg10[%c0_61, %c0_62] : memref<128x128xbf16, #tpu.memory_space<vmem>>, vector<1x128xbf16>
      tpu.vector_store %arg10[%c0_61, %c0_62], %149 {strides = array<i32>} : memref<128x128xbf16, #tpu.memory_space<vmem>>, vector<1x128xbf16>,
      %151 = arith.mulf %146, %40 : vector<1x128xf32>
      %152 = arith.addf %132, %151 : vector<1x128xf32>
      %153 = arith.truncf %152 : vector<1x128xf32> to vector<1x128xbf16>
      %c0_63 = arith.constant 0 : index
      %c0_64 = arith.constant 0 : index
      %154 = vector.load %arg11[%c0_63, %c0_64] : memref<128x128xbf16, #tpu.memory_space<vmem>>, vector<1x128xbf16>
      tpu.vector_store %arg11[%c0_63, %c0_64], %153 {strides = array<i32>} : memref<128x128xbf16, #tpu.memory_space<vmem>>, vector<1x128xbf16>,
      %c0_65 = arith.constant 0 : index
      %c0_66 = arith.constant 0 : index
      %155 = vector.load %arg12[%c0_65, %c0_66] : memref<128x128xf32, #tpu.memory_space<vmem>>, vector<128x128xf32>
      tpu.vector_store %arg12[%c0_65, %c0_66], %62 {strides = array<i32>} : memref<128x128xf32, #tpu.memory_space<vmem>>, vector<128x128xf32>,
    } else {
    }
    %c0 = arith.constant 0 : index
    %c0_1 = arith.constant 0 : index
    %3 = vector.load %arg10[%c0, %c0_1] : memref<128x128xbf16, #tpu.memory_space<vmem>>, vector<128x128xbf16>
    %c0_2 = arith.constant 0 : index
    %c0_3 = arith.constant 0 : index
    %4 = vector.load %arg6[%c0_2, %c0_3] : memref<128x128xbf16, #tpu.memory_space<vmem>>, vector<128x128xbf16>
    %cst = arith.constant dense<0.000000e+00> : vector<128x128xf32>
    %5 = tpu.matmul %3, %4, %cst {dimension_numbers = #tpu.dot_dimension_numbers<[1], [0], [0], [1], [0, 0, 1, 1], [], []>} : vector<128x128xbf16>, vector<128x128xbf16>, vector<128x128xf32> -> vector<128x128xf32>
    %c0_4 = arith.constant 0 : index
    %c0_5 = arith.constant 0 : index
    %6 = vector.load %arg11[%c0_4, %c0_5] : memref<128x128xbf16, #tpu.memory_space<vmem>>, vector<128x128xbf16>
    %c0_6 = arith.constant 0 : index
    %c0_7 = arith.constant 0 : index
    %7 = vector.load %arg7[%c0_6, %c0_7] : memref<128x128xbf16, #tpu.memory_space<vmem>>, vector<128x128xbf16>
    %cst_8 = arith.constant dense<0.000000e+00> : vector<128x128xf32>
    %8 = tpu.matmul %6, %7, %cst_8 {dimension_numbers = #tpu.dot_dimension_numbers<[1], [0], [0], [1], [0, 0, 1, 1], [], []>} : vector<128x128xbf16>, vector<128x128xbf16>, vector<128x128xf32> -> vector<128x128xf32>
    %cst_9 = arith.constant 2.000000e+01 : f32
    %9 = vector.broadcast %cst_9 : f32 to vector<128x128xf32>
    %10 = arith.minimumf %8, %9 : vector<128x128xf32>
    %11 = math.exp %10 : vector<128x128xf32>
    %cst_10 = arith.constant 1.000000e+00 : f32
    %12 = vector.broadcast %cst_10 : f32 to vector<128x128xf32>
    %13 = arith.addf %12, %11 : vector<128x128xf32>
    %14 = arith.mulf %13, %13 : vector<128x128xf32>
    %cst_11 = arith.constant 1.000000e+00 : f32
    %15 = vector.broadcast %cst_11 : f32 to vector<128x128xf32>
    %16 = arith.addf %14, %15 : vector<128x128xf32>
    %17 = tpu.reciprocal %16 {approx = true} : vector<128x128xf32> -> vector<128x128xf32>
    %cst_12 = arith.constant 2.000000e+00 : f32
    %18 = vector.broadcast %cst_12 : f32 to vector<128x128xf32>
    %19 = arith.mulf %18, %17 : vector<128x128xf32>
    %cst_13 = arith.constant 1.000000e+00 : f32
    %20 = vector.broadcast %cst_13 : f32 to vector<128x128xf32>
    %21 = arith.subf %20, %19 : vector<128x128xf32>
    %22 = arith.mulf %8, %21 : vector<128x128xf32>
    %c0_14 = arith.constant 0 : index
    %c0_15 = arith.constant 0 : index
    %23 = vector.load %arg12[%c0_14, %c0_15] : memref<128x128xf32, #tpu.memory_space<vmem>>, vector<128x128xf32>
    %24 = arith.mulf %5, %22 : vector<128x128xf32>
    %25 = arith.truncf %24 : vector<128x128xf32> to vector<128x128xbf16>
    %c0_16 = arith.constant 0 : index
    %c0_17 = arith.constant 0 : index
    %26 = vector.load %arg8[%c0_16, %c0_17] : memref<128x128xbf16, #tpu.memory_space<vmem>>, vector<128x128xbf16>
    %cst_18 = arith.constant dense<0.000000e+00> : vector<128x128xf32>
    %27 = tpu.matmul %25, %26, %cst_18 {dimension_numbers = #tpu.dot_dimension_numbers<[1], [0], [0], [1], [0, 0, 1, 1], [], []>} : vector<128x128xbf16>, vector<128x128xbf16>, vector<128x128xf32> -> vector<128x128xf32>
    %28 = arith.addf %23, %27 : vector<128x128xf32>
    %c0_19 = arith.constant 0 : index
    %c0_20 = arith.constant 0 : index
    %29 = vector.load %arg12[%c0_19, %c0_20] : memref<128x128xf32, #tpu.memory_space<vmem>>, vector<128x128xf32>
    tpu.vector_store %arg12[%c0_19, %c0_20], %28 {strides = array<i32>} : memref<128x128xf32, #tpu.memory_space<vmem>>, vector<128x128xf32>,
    %c1_i32 = arith.constant 1 : i32
    %30 = arith.cmpi eq, %arg2, %c1_i32 : i32
    %31 = arith.extui %30 : i1 to i32
    %c0_i32_21 = arith.constant 0 : i32
    %32 = arith.cmpi ne, %31, %c0_i32_21 : i32
    scf.if %32 {
      %c0_22 = arith.constant 0 : index
      %c0_23 = arith.constant 0 : index
      %33 = vector.load %arg12[%c0_22, %c0_23] : memref<128x128xf32, #tpu.memory_space<vmem>>, vector<128x128xf32>
      %34 = arith.truncf %33 : vector<128x128xf32> to vector<128x128xbf16>
      %c0_24 = arith.constant 0 : index
      %c0_25 = arith.constant 0 : index
      %c0_26 = arith.constant 0 : index
      %35 = vector.load %arg9[%c0_24, %c0_25, %c0_26] : memref<1x128x128xbf16, #tpu.memory_space<vmem>>, vector<1x128x128xbf16>
      %36 = vector.shape_cast %35 : vector<1x128x128xbf16> to vector<128x128xbf16>
      %37 = vector.shape_cast %34 : vector<128x128xbf16> to vector<1x128x128xbf16>
      tpu.vector_store %arg9[%c0_24, %c0_25, %c0_26], %37 {strides = array<i32>} : memref<1x128x128xbf16, #tpu.memory_space<vmem>>, vector<1x128x128xbf16>,
    } else {
    }
    return
  }
  func.func @transform_0(%arg0: i32, %arg1: i32, %arg2: i32) -> (i32, i32, i32) {
    %c0_i32 = arith.constant 0 : i32
    %c0_i32_0 = arith.constant 0 : i32
    return %arg0, %arg1, %c0_i32 : i32, i32, i32
  }
  func.func @transform_1(%arg0: i32, %arg1: i32, %arg2: i32) -> (i32, i32, i32) {
    %c16_i32 = arith.constant 16 : i32
    %0 = arith.muli %arg1, %c16_i32 : i32
    %c1_i32 = arith.constant 1 : i32
    %1 = arith.subi %0, %c1_i32 : i32
    %c0_i32 = arith.constant 0 : i32
    %2 = arith.maxsi %1, %c0_i32 : i32
    %c0_i32_0 = arith.constant 0 : i32
    %c0_i32_1 = arith.constant 0 : i32
    return %arg0, %2, %c0_i32_0 : i32, i32, i32
  }
  func.func @transform_2(%arg0: i32, %arg1: i32, %arg2: i32) -> (i32, i32) {
    %c0_i32 = arith.constant 0 : i32
    %c0_i32_0 = arith.constant 0 : i32
    %c0_i32_1 = arith.constant 0 : i32
    return %c0_i32, %c0_i32_0 : i32, i32
  }
  func.func @transform_3(%arg0: i32, %arg1: i32, %arg2: i32) -> (i32, i32) {
    %c0_i32 = arith.constant 0 : i32
    %c0_i32_0 = arith.constant 0 : i32
    return %c0_i32, %arg2 : i32, i32
  }
  func.func @transform_4(%arg0: i32, %arg1: i32, %arg2: i32) -> (i32, i32) {
    %c0_i32 = arith.constant 0 : i32
    %c0_i32_0 = arith.constant 0 : i32
    return %c0_i32, %arg2 : i32, i32
  }
  func.func @transform_5(%arg0: i32, %arg1: i32, %arg2: i32) -> (i32, i32) {
    %c0_i32 = arith.constant 0 : i32
    %c0_i32_0 = arith.constant 0 : i32
    return %arg2, %c0_i32 : i32, i32
  }
  func.func @transform_6(%arg0: i32, %arg1: i32, %arg2: i32) -> (i32, i32, i32) {
    %c0_i32 = arith.constant 0 : i32
    %c0_i32_0 = arith.constant 0 : i32
    return %arg0, %arg1, %c0_i32 : i32, i32, i32
  }
}

</mosaic_0001>

<bundles_post_ra>
// kernel: tpu_custom_call.1
= control target key start
LH: loop header
LB: loop body
LE: loop exit
PB: predicated region body
PF: predicated region fallthrough
CT: control target
= control target key end

     0   :  { %s4784_s0 = inlined_call_operand.hbm [shape: f32[2,256,128], index: 0, kind: input, shape index: {}]   ;;  %s4785_s1 = inlined_call_operand.hbm [shape: f32[2,256,128], index: 1, kind: input, shape index: {}]   ;;  %s4786_s2 = inlined_call_operand.hbm [shape: f32[8,128], index: 2, kind: input, shape index: {}]   ;;  %s4787_s3 = inlined_call_operand.hbm [shape: bf16[128,256], index: 3, kind: input, shape index: {}]   ;;  %s4788_s4 = inlined_call_operand.hbm [shape: bf16[128,256], index: 4, kind: input, shape index: {}]   ;;  %s4789_s5 = inlined_call_operand.hbm [shape: bf16[256,128], index: 5, kind: input, shape index: {}]   ;;  %s4790_s6 = inlined_call_operand.hbm [shape: bf16[2,256,128], index: 6, kind: output, shape index: {}]  }
   0x1   :  { %4828 = sst [smem:[#allocation41_spill]] %s4784_s0 }
   0x2   :  { %4829 = sst [smem:[#allocation42_spill]] %s4785_s1 }
   0x3   :  { %4830 = sst [smem:[#allocation43_spill]] %s4786_s2 }
   0x4   :  { %4831 = sst [smem:[#allocation44_spill]] %s4787_s3 }
   0x5   :  { %4832 = sst [smem:[#allocation45_spill]] %s4788_s4 }
   0x6   :  { %4833 = sst [smem:[#allocation46_spill]] %s4789_s5 }
   0x7   :  { %4834 = sst [smem:[#allocation47_spill]] %s4790_s6 }
   0x8   :  { %11 = vsyncpa [#allocation6], 0 }
   0x9   :  { %13 = vsyncpa [#allocation6 + $0x1], 0 }
   0xa   :  { %14 = vsyncpa [#allocation9], 0 }
   0xb   :  { %16 = vsyncpa [#allocation9 + $0x1], 0 }
   0xc   :  { %17 = vsyncpa [#allocation12], 0 }
   0xd   :  { %19 = vsyncpa [#allocation12 + $0x1], 0 }
   0xe   :  { %20 = vsyncpa [#allocation15], 0 }
   0xf   :  { %22 = vsyncpa [#allocation15 + $0x1], 0 }
  0x10   :  { %23 = vsyncpa [#allocation7], 0 }
  0x11   :  { %25 = vsyncpa [#allocation7 + $0x1], 0  ;;  %s3716_s21 = smov 0   ;;  %s3718_s22 = smov 0  }
  0x12   :  { %s3720_s23 = smov 0   ;;  %s3722_s24 = smov 0  }
  0x13   :  { %s3724_s25 = smov 0   ;;  %s3726_s26 = smov 0  }
  0x14   :  { %s3728_s27 = smov 0   ;;  %s3730_s28 = smov 0  }
  0x15   :  { %s3732_s29 = smov 0   ;;  %s3734_s30 = smov 0  }
  0x16   :  { %s3736_s7 = smov 0   ;;  %s3738_s8 = smov 0  }
  0x17   :  { %s3740_s9 = smov 0   ;;  %s3742_s10 = smov 0  }
  0x18   :  { %s3744_s11 = smov 0   ;;  %s3746_s12 = smov 0  }
  0x19 LB: > { %4835 = sst [smem:[#allocation23_spill]] %s3610_s22  ;;  %s3795_s13 = sadd.s32 4294967295, %s3666_s12   ;;  %s3666_s12 = sphi %s3746_s12, %s31_s12   ;;  %s3662_s11 = sphi %s3744_s11, %s4918_s11   ;;  %s3658_s10 = sphi %s3742_s10, %s4917_s10   ;;  %s3654_s9 = sphi %s3740_s9, %s4926_s9   ;;  %s3650_s8 = sphi %s3738_s8, %s4915_s8   ;;  %s3646_s7 = sphi %s3736_s7, %s4914_s7   ;;  %s3642_s30 = sphi %s3734_s30, %s4925_s30   ;;  %s3638_s29 = sphi %s3732_s29, %s4924_s29   ;;  %s3634_s28 = sphi %s3730_s28, %s4923_s28   ;;  %s3630_s27 = sphi %s3728_s27, %s4922_s27   ;;  %s3626_s26 = sphi %s3726_s26, %s4921_s26   ;;  %s3622_s25 = sphi %s3724_s25, %s4920_s25   ;;  %s3618_s24 = sphi %s3722_s24, %s4919_s24   ;;  %s3614_s23 = sphi %s3720_s23, %s4913_s23   ;;  %s3610_s22 = sphi %s3718_s22, %s4912_s22   ;;  %s3606_s21 = sphi %s3716_s21, %s4911_s21  }
  0x1a   : > { %4836 = sst [smem:[#allocation24_spill]] %s3614_s23  ;;  %s2489_s14 = sadd.s32 4294967294, %s3666_s12  }
  0x1b   : > { %4837 = sst [smem:[#allocation25_spill]] %s3630_s27  ;;  %p72_p0 = scmp.ne.s32.totalorder %s3634_s28, %s3630_s27 }
  0x1c   : > { %4838 = sst [smem:[#allocation26_spill]] %s3642_s30  ;;  %p4801_p1 = scmp.eq.s32.totalorder %s3795_s13, 0 }
  0x1d   : > { %4839 = sst [smem:[#allocation27_spill]] %s3646_s7  ;;  %p155_p2 = scmp.ne.s32.totalorder %s3610_s22, %s3606_s21 }
  0x1e   : > { %4840 = sst [smem:[#allocation28_spill]] %s3650_s8  ;;  %p3805_p4 = por %p4801_p1, %p72_p0 }
  0x1f   : > { %4841 = sst [smem:[#allocation29_spill]] %s3658_s10  ;;  %p239_p5 = scmp.eq.s32.totalorder %s2489_s14, 7 }
  0x20   : > { %4842 = sst [smem:[#allocation30_spill]] %s3662_s11  ;;  %p3811_p6 = por %p155_p2, %p4801_p1 }
  0x21   : > { %s4843_s15 = scalar_select %p3805_p4, 1, 0 }
  0x22   : > { %s4845_s16 = scalar_select %p3811_p6, 1, 0 }
  0x23   : > { %4844 = sst [smem:[#allocation31_spill]] %s4843_s15  ;;  %p2494_p7 = scmp.ge.s32.totalorder %s3666_s12, 1 }
  0x24   : > { %4846 = sst [smem:[#allocation32_spill]] %s4845_s16  ;;  %p3816_p8 = por %p239_p5, %p72_p0 }
  0x25   : > { %p246_p9 = scmp.lt.s32.totalorder %s3666_s12, 9  ;;  %s3668_s19 = smov [#allocation10]  }
  0x26   : > { %s4847_s17 = scalar_select %p3816_p8, 1, 0 }
  0x27   : > { %p3821_p10 = pnand %p2494_p7, %p246_p9  ;;  %s259_s20 = sshll.u32 %s3668_s19, 4  ;;  %s260_s20 = int_to_ptr.vmem [resolvable:$true] %s259_s20 }
  0x28   : > { %4848 = sst [smem:[#allocation33_spill]] %s4847_s17  ;;  %s43_s14 = sadd.s32 1, %s3654_s9 }
  0x29   : > { %s4849_s18 = scalar_select %p3821_p10, 1, 0 }
  0x2a   : > { %p2989_p11 = pneg %p3821_p10  ;;  %p4817_p13 = scmp.eq.s32.totalorder %s3666_s12, 0 }
  0x2b   : > { %4850 = sst [smem:[#allocation34_spill]] %s4849_s18  ;;  %p3835_p0 = scmp.ge.s32.totalorder %s43_s14, 2 }
  0x2c   : > { %p3829_p12 = pnand %p2989_p11, %p4801_p1  ;;  %s3335_s27 = scalar_lea.vmem %s260_s20, 128 }
  0x2d   : > { %p3336_p5 = scmp.ne.s32.totalorder %s260_s20, %s3335_s27  ;;  %p3343_p3 = scmp.lt.s32.totalorder %s260_s20, %s260_s20 }
  0x2e   : > { %p3326_p2 = pneg %p3829_p12  ;;  %p3344_p8 = scmp.lt.s32.totalorder %s3335_s27, %s3335_s27 }
  0x30   : > { %p3338_p7 = pnand %p3336_p5, %p3326_p2  ;;  %p3345_p6 = por %p3344_p8, %p3343_p3 }
  0x32   : > { %p3339_p9 = pneg %p3338_p7 }
  0x34   : > { %p3346_p11 = pnand %p3345_p6, %p3339_p9 }
  0x36   : > { %3349 = shalt.err (!%p3346_p11)
}
  0x37   : > { %s4853_s2 = sld [smem:[#allocation43_spill]]  ;;  %s4928_s14 = smov (%p3835_p0, %s43_s14), 0 }
  0x38   : > { %4854 = sst [smem:[#allocation35_spill]] %s4928_s14  ;;  %s142_s6 = sadd.s32 1, %s3614_s23 }
  0x39   : > { %p149_p3 = scmp.ne.s32.totalorder %s3614_s23, %s3610_s22  ;;  %s139_s27 = ssub.s32 %s3654_s9, %s4928_s14 }
  0x3a   : > { %p3014_p6 = scmp.lt.s32.totalorder %s3666_s12, 8  ;;  %p140_p8 = scmp.eq.s32.totalorder %s139_s27, 0 }
  0x3b   : > { %p151_p2 = por %p149_p3, %p4817_p13  ;;  %s4803_s21 = sand.u32 1, %s3666_s12  }
  0x3c   : > { %s3860_s19 = scalar_select %p140_p8, %s3614_s23, %s142_s6  }
  0x3d   : > { %2992 = dma.hbm_to_vmem [thread:$0]  (!%p3829_p12), %s4853_s2, 128, %s260_s20, [#allocation9]  }
  0x3e   : > { %4855 = sst [smem:[#allocation36_spill]] %s3860_s19  ;;  %s4800_s8 = sand.u32 1, %s3614_s23  }
  0x3f   : > { %s3865_s7 = sshll.u32 %s4800_s8, 6  ;;  %s4802_s20 = sshll.u32 %s3654_s9, 6 }
  0x40   : > { %s4856_s3 = sld [smem:[#allocation44_spill]]  ;;  %s321_s22 = scalar_lea.vmem [#allocation11], %s3865_s7 }
  0x41   : > { %s327_s14 = sshll.u32 %s321_s22, 4  ;;  %p3876_p12 = pnand %p3014_p6, %p151_p2  ;;  %s328_s14 = int_to_ptr.vmem [resolvable:$true] %s327_s14 }
  0x42   : > { %s3882_s6 = scalar_lea.sflag [#allocation12], %s4803_s21  ;;  %s3363_s8 = scalar_lea.vmem %s328_s14, 1024 }
  0x43   : > { %s4857_s27 = scalar_select %p3876_p12, 1, 0 }
  0x44   : > { %p4816_p5 = pneg %p3876_p12  ;;  %p3364_p7 = scmp.ne.s32.totalorder %s328_s14, %s3363_s8 }
  0x45   : > { %4858 = sst [smem:[#allocation37_spill]] %s4857_s27  ;;  %s3669_s2 = smov [#allocation11]  }
  0x46   : > { %s326_s16 = scalar_lea.hbm %s4856_s3, %s4802_s20  ;;  %p3366_p9 = pnand %p3364_p7, %p4816_p5 }
  0x47   : > { %s3368_s22 = sshll.u32 %s3669_s2, 4  ;;  %s3369_s22 = int_to_ptr.vmem [resolvable:$false] %s3368_s22 }
  0x48   : > { %p3367_p11 = pneg %p3366_p9  ;;  %s3370_s30 = scalar_lea.vmem %s3369_s22, 2048 }
  0x49   : > { %p3371_p3 = scmp.lt.s32.totalorder %s328_s14, %s3369_s22  ;;  %p3372_p8 = scmp.lt.s32.totalorder %s3370_s30, %s3363_s8 }
  0x4b   : > { %p3373_p2 = por %p3372_p8, %p3371_p3 }
  0x4d   : > { %p3374_p1 = pnand %p3373_p2, %p3367_p11 }
  0x4f   : > { %3377 = shalt.err (!%p3374_p1)
}
  0x50   : > { %s4814_s20 = smov 128   ;;  %s4810_s8 = smov 64  }
  0x51   : > { %s4812_s2 = smov 4   ;;  %s4859_s22 = sshll.u32 %s3654_s9, 6 }
  0x52   : > { %3002 = dma.hbm_to_vmem [thread:$0]  (!%p3876_p12), %s326_s16, 1024, %s328_s14, %s3882_s6, %s4814_s20, %s4810_s8, %s4812_s2  }
  0x53   : > { %s4860_s4 = sld [smem:[#allocation45_spill]]  ;;  %p66_p1 = scmp.ne.s32.totalorder %s3638_s29, %s3634_s28 }
  0x54   : > { %s2490_s5 = sshll.u32 %s3658_s10, 4  ;;  %s270_s23 = sand.u32 1, %s3638_s29  }
  0x55   : > { %s4820_s1 = sshll.u32 %s3662_s11, 5  ;;  %p68_p7 = por %p4817_p13, %p66_p1 }
  0x56   : > { %p4861_p9 = scmp.eq.s32.totalorder %s3795_s13, 7  ;;  %s2497_s16 = sshll.u32 %s270_s23, 7 }
  0x57   : > { %s280_s14 = sadd.s32 %s4820_s1, %s2490_s5  ;;  %s4864_s0 = sld [smem:[#allocation41_spill]] }
  0x58   : > { %p3914_p11 = por %p4861_p9, %p66_p1  ;;  %s2500_s21 = sshll.u32 %s280_s14, 7 }
  0x59   : > { %s3900_s3 = scalar_lea.hbm %s4860_s4, %s4859_s22  ;;  %s274_s22 = scalar_lea.vmem [#allocation5], %s2497_s16 }
  0x5a   : > { %s4862_s27 = scalar_select %p3914_p11, 1, 0 }
  0x5b   : > { %s283_s30 = sshll.u32 %s274_s22, 4  ;;  %p3927_p3 = pnand %p3014_p6, %p68_p7  ;;  %s284_s30 = int_to_ptr.vmem [resolvable:$true] %s283_s30 }
  0x5c   : > { %4863 = sst [smem:[#allocation38_spill]] %s4862_s27  ;;  %s271_s19 = scalar_lea.sflag [#allocation6], %s270_s23 }
  0x5d   : > { %s282_s18 = scalar_lea.hbm %s4864_s0, %s2500_s21  ;;  %p3380_p8 = pneg %p3927_p3 }
  0x5e   : > { %s3391_s20 = scalar_lea.vmem %s284_s30, 2048  ;;  %s3673_s16 = smov [#allocation5]  }
  0x5f   : > { %p3392_p2 = scmp.ne.s32.totalorder %s284_s30, %s3391_s20  ;;  %s3396_s14 = sshll.u32 %s3673_s16, 4  ;;  %s3397_s14 = int_to_ptr.vmem [resolvable:$false] %s3396_s14 }
  0x60   : > { %s3398_s22 = scalar_lea.vmem %s3397_s14, 4096  ;;  %p3399_p5 = scmp.lt.s32.totalorder %s284_s30, %s3397_s14 }
  0x61   : > { %p3394_p1 = pnand %p3392_p2, %p3380_p8  ;;  %p3400_p13 = scmp.lt.s32.totalorder %s3398_s22, %s3391_s20 }
  0x63   : > { %p3395_p9 = pneg %p3394_p1  ;;  %p3401_p11 = por %p3400_p13, %p3399_p5 }
  0x65   : > { %p3402_p4 = pnand %p3401_p11, %p3395_p9 }
  0x67   : > { %3405 = shalt.err (!%p3402_p4)
}
  0x68   : > { %s3674_s8 = smov 8   ;;  %s4866_s2 = smov 128  }
  0x69   : > { %2996 = dma.hbm_to_vmem [thread:$0]  (!%p3927_p3), %s282_s18, 2048, %s284_s30, %s271_s19, %s4866_s2, %s4866_s2, %s3674_s8  }
  0x6a   : > { %s2491_s23 = sadd.s32 4294967295, %s2490_s5  ;;  %s4867_s20 = sadd.s32 1, %s3658_s10 }
  0x6b   : > { %s4930_s20 = smov (!%p3835_p0, %s4867_s20), %s3658_s10  ;;  %p84_p4 = scmp.gt.s32.totalorder %s2491_s23, 0 }
  0x6c   : > { %s95_s15 = sadd.s32 1, %s3626_s26  ;;  %p48_p13 = scmp.ge.s32.totalorder %s4930_s20, 2 }
  0x6d   : > { %p102_p5 = scmp.ne.s32.totalorder %s3626_s26, %s3622_s25  ;;  %s4932_s23 = smov (!%p84_p4, %s2491_s23), 0 }
  0x6e   : > { %s4934_s20 = smov (%p48_p13, %s4930_s20), 0  ;;  %s4869_s21 = sadd.s32 1, %s3662_s11 }
  0x6f   : > { %4868 = sst [smem:[#allocation39_spill]] %s4934_s20  ;;  %s4936_s21 = smov (!%p48_p13, %s4869_s21), %s3662_s11 }
  0x70   : > { %s55_s18 = ssub.s32 %s3658_s10, %s4934_s20  ;;  %s2492_s5 = sshll.u32 %s4934_s20, 4 }
  0x71   : > { %p52_p0 = scmp.ge.s32.totalorder %s4936_s21, 2  ;;  %s2493_s17 = sadd.s32 4294967295, %s2492_s5 }
  0x72   : > { %p88_p7 = scmp.gt.s32.totalorder %s2493_s17, 0  ;;  %p4870_p11 = scmp.eq.s32.totalorder %s3666_s12, 0 }
  0x73   : > { %s4938_s21 = smov (%p52_p0, %s4936_s21), 0  ;;  %p108_p8 = scmp.ne.s32.totalorder %s3622_s25, %s3618_s24 }
  0x74   : > { %p3957_p3 = por %p102_p5, %p4870_p11  ;;  %4872 = sst [smem:[#allocation40_spill]] %s4938_s21 }
  0x75   : > { %s4940_s17 = smov (!%p88_p7, %s2493_s17), 0  ;;  %s54_s30 = ssub.s32 %s3662_s11, %s4938_s21 }
  0x76   : > { %s56_s16 = sor.u32 %s55_s18, %s54_s30  ;;  %s91_s14 = ssub.s32 %s4932_s23, %s4940_s17 }
  0x77   : > { %p57_p2 = scmp.eq.s32.totalorder %s56_s16, 0  ;;  %s92_s22 = sor.u32 %s91_s14, %s54_s30 }
  0x78   : > { %p93_p1 = scmp.eq.s32.totalorder %s92_s22, 0  ;;  %p4873_p9 = scmp.eq.s32.totalorder %s3795_s13, 0 }
  0x79   : > { %s4875_s5 = sadd.s32 1, %s3638_s29  ;;  %s295_s24 = sand.u32 1, %s3626_s26  }
  0x7a   : > { %p3969_p4 = por %p108_p8, %p4873_p9  ;;  %s2501_s18 = sshll.u32 %s295_s24, 3 }
  0x7b   : > { %s3976_s1 = scalar_select %p57_p2, %s3638_s29, %s4875_s5  }
  0x7c   : > { %s4874_s8 = scalar_select %p3969_p4, 1, 0 }
  0x7d   : > { %s3979_s0 = scalar_select %p93_p1, %s3626_s26, %s95_s15  }
  0x7e   : > { %s4876_s4 = sshll.u32 %s3662_s11, 5  ;;  %s4877_s30 = sld [smem:[#allocation42_spill]] }
  0x7f   : > { %s306_s21 = sadd.s32 %s4876_s4, %s4932_s23  ;;  %s297_s22 = scalar_lea.vmem [#allocation8], %s2501_s18 }
  0x80   : > { %s2505_s17 = sshll.u32 %s306_s21, 7  ;;  %s310_s10 = sshll.u32 %s297_s22, 4  ;;  %s311_s10 = int_to_ptr.vmem [resolvable:$true] %s310_s10 }
  0x81   : > { %p3991_p13 = pnand %p3014_p6, %p3957_p3  ;;  %s341_s15 = scalar_lea.vmem [#allocation13], %s3865_s7 }
  0x82   : > { %s347_s5 = sshll.u32 %s341_s15, 4  ;;  %s4879_s24 = sand.u32 1, %s3666_s12   ;;  %s348_s5 = int_to_ptr.vmem [resolvable:$true] %s347_s5 }
  0x83   : > { %s294_s11 = scalar_lea.sflag [#allocation9], %s4879_s24  ;;  %p3408_p5 = pneg %p3991_p13 }
  0x84   : > { %s308_s14 = scalar_lea.hbm %s4877_s30, %s2505_s17  ;;  %s3419_s4 = scalar_lea.vmem %s311_s10, 128 }
  0x85   : > { %p3420_p0 = scmp.ne.s32.totalorder %s311_s10, %s3419_s4  ;;  %s3675_s23 = smov [#allocation8]  }
  0x86   : > { %s3424_s20 = sshll.u32 %s3675_s23, 4  ;;  %s3425_s20 = int_to_ptr.vmem [resolvable:$false] %s3424_s20 }
  0x87   : > { %p3422_p7 = pnand %p3420_p0, %p3408_p5  ;;  %s3426_s21 = scalar_lea.vmem %s3425_s20, 256 }
  0x88   : > { %p3427_p8 = scmp.lt.s32.totalorder %s311_s10, %s3425_s20  ;;  %p3428_p6 = scmp.lt.s32.totalorder %s3426_s21, %s3419_s4 }
  0x89   : > { %p3423_p11 = pneg %p3422_p7 }
  0x8a   : > { %p3429_p3 = por %p3428_p6, %p3427_p8 }
  0x8c   : > { %p3430_p2 = pnand %p3429_p3, %p3423_p11 }
  0x8e   : > { %3433 = shalt.err (!%p3430_p2)
}
  0x8f   : > { %2999 = dma.hbm_to_vmem [thread:$0]  (!%p3991_p13), %s308_s14, 128, %s311_s10, %s294_s11  }
  0x90   : > { %s3447_s18 = scalar_lea.vmem %s348_s5, 1024  ;;  %p4881_p9 = pneg %p3876_p12 }
  0x91   : > { %p3448_p1 = scmp.ne.s32.totalorder %s348_s5, %s3447_s18  ;;  %s3676_s17 = smov [#allocation13]  }
  0x92   : > { %s3452_s16 = sshll.u32 %s3676_s17, 4  ;;  %s3453_s16 = int_to_ptr.vmem [resolvable:$false] %s3452_s16 }
  0x93   : > { %p3450_p5 = pnand %p3448_p1, %p4881_p9  ;;  %s3454_s30 = scalar_lea.vmem %s3453_s16, 2048 }
  0x94   : > { %p3455_p7 = scmp.lt.s32.totalorder %s348_s5, %s3453_s16  ;;  %p3456_p4 = scmp.lt.s32.totalorder %s3454_s30, %s3447_s18 }
  0x95   : > { %p3451_p0 = pneg %p3450_p5 }
  0x96   : > { %p3457_p8 = por %p3456_p4, %p3455_p7 }
  0x98   : > { %p3458_p11 = pnand %p3457_p8, %p3451_p0 }
  0x9a   : > { %3461 = shalt.err (!%p3458_p11)
}
  0x9b   : > { %s4882_s27 = smov 4   ;;  %s4883_s10 = smov 64  }
  0x9c   : > { %s4884_s11 = sld [smem:[#allocation24_spill]]  ;;  %s2621_s14 = sshll.u32 %s3654_s9, 10 }
  0x9d   : > { %3005 = dma.hbm_to_vmem [thread:$0]  (!%p3876_p12), %s3900_s3, 1024, %s348_s5, %s3882_s6, %s4866_s2, %s4883_s10, %s4882_s27  }
  0x9e   : > { %s361_s22 = scalar_lea.vmem [#allocation14], %s3865_s7  ;;  %s4885_s23 = sld [smem:[#allocation46_spill]] }
  0x9f   : > { %s368_s15 = sshll.u32 %s361_s22, 4  ;;  %p4887_p13 = pmov %p4881_p9  ;;  %s369_s15 = int_to_ptr.vmem [resolvable:$true] %s368_s15 }
  0xa0   : > { %s3475_s17 = scalar_lea.vmem %s369_s15, 1024  ;;  %s3677_s16 = smov [#allocation14]  }
  0xa1   : > { %p3476_p4 = scmp.ne.s32.totalorder %s369_s15, %s3475_s17  ;;  %s3480_s30 = sshll.u32 %s3677_s16, 4  ;;  %s3481_s30 = int_to_ptr.vmem [resolvable:$false] %s3480_s30 }
  0xa2   : > { %s4886_s21 = sand.u32 1, %s4884_s11   ;;  %s3482_s3 = scalar_lea.vmem %s3481_s30, 2048 }
  0xa3   : > { %s358_s18 = scalar_lea.sflag [#allocation15], %s4886_s21  ;;  %p3478_p6 = pnand %p3476_p4, %p4887_p13 }
  0xa4   : > { %s367_s20 = scalar_lea.hbm %s4885_s23, %s2621_s14  ;;  %p3483_p2 = scmp.lt.s32.totalorder %s369_s15, %s3481_s30 }
  0xa5   : > { %p3479_p3 = pneg %p3478_p6  ;;  %p3484_p1 = scmp.lt.s32.totalorder %s3482_s3, %s3475_s17 }
  0xa7   : > { %p3485_p9 = por %p3484_p1, %p3483_p2 }
  0xa9   : > { %p3486_p5 = pnand %p3485_p9, %p3479_p3 }
  0xab   : > { %3489 = shalt.err (!%p3486_p5)
}
  0xac   : > { %3008 = dma.hbm_to_vmem [thread:$0]  (!%p3876_p12), %s367_s20, 1024, %s369_s15, %s358_s18, %s4883_s10, %s4883_s10, %s4882_s27  }
  0xad   : > { %380 = sbr.rel (%p3821_p10) target bundleno = 1450 (0x5aa), region = 44  ;;  %s4889_s6 = sld [smem:[#allocation31_spill]] (!%p3821_p10) }
  0xae   : > { %s4030_s2 = sand.u32 (!%p3821_p10), 1, %s3634_s28  }
  0xaf   : > { %s2514_s5 = sshll.u32 (!%p3821_p10), %s4030_s2, 7  ;;  %s383_s11 = scalar_lea.sflag (!%p3821_p10), [#allocation6], %s4030_s2 }
  0xb0   : > { %s4034_s14 = scalar_lea.vmem (!%p3821_p10), [#allocation5], %s2514_s5 }
  0xb3   : > { %p4890_p0 = scmp.ne.s32.totalorder %s4889_s6, 0 }
  0xb5   : > { %3581 = dma.done.wait (%p4890_p0), %s383_s11, 2048  }
  0xb6   : > { %3583 = vsyncadd (%p4890_p0), %s383_s11, 4294965248  ;;  %s391_s19 = sand.u32 1, %s3795_s13   ;;  %s393_s27 = sand.u32 1, %s3622_s25  }
  0xb7   : > { %s2515_s10 = sshll.u32 %s393_s27, 3  ;;  %s392_s22 = scalar_lea.sflag [#allocation9], %s391_s19 }
  0xb8   : > { %s395_s15 = scalar_lea.vmem [#allocation8], %s2515_s10  ;;  %p4891_p10 = scmp.ne.s32.totalorder %s4874_s8, 0 }
  0xba   : > { %3585 = dma.done.wait (%p4891_p10), %s392_s22, 128  }
  0xbb   : > { %3587 = vsyncadd (%p4891_p10), %s392_s22, 4294967168  ;;  %p4892_p12 = scmp.eq.s32.totalorder %s3795_s13, 0 }
  0xbd   : > { %3589 = dma.done.wait (%p4892_p12), [#allocation9], 128   ;;  %p4893_p7 = pmov %p4892_p12 }
  0xbe   : > { %s4894_s24 = sld [smem:[#allocation23_spill]]  ;;  %s405_s21 = scalar_lea.sflag [#allocation12], %s391_s19 }
  0xbf   : > { %3591 = vsyncadd (%p4893_p7), [#allocation9], 4294967168  ;;  %s4895_s4 = sld [smem:[#allocation32_spill]] }
  0xc4   : > { %s406_s23 = sand.u32 1, %s4894_s24  }
  0xc5   : > { %s2517_s20 = sshll.u32 %s406_s23, 6  ;;  %p4896_p8 = scmp.ne.s32.totalorder %s4895_s4, 0 }
  0xc6   : > { %s4051_s18 = scalar_lea.vmem [#allocation11], %s2517_s20 }
  0xc7   : > { %3593 = dma.done.wait (%p4896_p8), %s405_s21, 2048  }
  0xc8   : > { %3595 = vsyncadd (%p4896_p8), %s405_s21, 4294965248  ;;  %s4057_s8 = scalar_lea.vmem [#allocation13], %s2517_s20  ;;  %s423_s17 = scalar_lea.sflag [#allocation15], %s406_s23 }
  0xc9   : > { %s4059_s16 = scalar_lea.vmem [#allocation14], %s2517_s20 }
  0xca   : > { %3597 = dma.done.wait (%p4896_p8), %s423_s17, 1024  }
  0xcb   : > { %3599 = vsyncadd (%p4896_p8), %s423_s17, 4294966272  ;;  %s2520_s13 = sshll.u32 %s4030_s2, 6  ;;  %s4897_s3 = sld [smem:[#allocation26_spill]] }
  0xcc   : > { %s4066_s30 = scalar_lea.vmem [#allocation16], %s2520_s13 }
  0xd1   : > { %p2521_p11 = scmp.ne.s32.totalorder %s4897_s3, 0 }
  0xd2   : > { %s4898_s7 = sld [smem:[#allocation27_spill]] (!%p2521_p11) }
  0xd3   : > { %486 = sbr.rel (%p2521_p11) target bundleno = 902 (0x386), region = 72 }
  0xd8   : > { %v488_v0 = vld [vmem:[%s4034_s14 + $0x8] sm:$0xff]  ;;  %vm943_vm0 = vcmask 1047559   ;;  %v502_v3 = vld [vmem:[%s4034_s14 + $0x78] sm:$0xff]  ;;  %v487_v4 = vld [vmem:[%s4034_s14] sm:$0xff]  ;;  %p986_p4 = scmp.gt.s32.totalorder %s4898_s7, 0  ;;  %vm1293_vm2 = vcmask 1040384  }
  0xd9   : > { %v4070_v1 = vld [vmem:[%s395_s15] sm:$0xff]  ;;  %511 = vadd.xlane.f32.xlu1 %v488_v0  ;;  %v490_v5 = vld [vmem:[%s4034_s14 + $0x18] sm:$0xff]  ;;  %v489_v6 = vld [vmem:[%s4034_s14 + $0x10] sm:$0xff]  ;;  %vm1294_vm3 = vsmask.f32 256 }
  0xda   : > { %v944_v2 = vsel %vm943_vm0, %v4070_v1, 0.0  ;;  %v492_v7 = vld [vmem:[%s4034_s14 + $0x28] sm:$0xff]  ;;  %v491_v8 = vld [vmem:[%s4034_s14 + $0x20] sm:$0xff]  ;;  %v494_v9 = vld [vmem:[%s4034_s14 + $0x38] sm:$0xff]  ;;  %s4511_s6 = scalar_select %p986_p4, 1, 0 }
  0xdb   : > { %945 = vadd.xlane.f32.xlu0 %v944_v2  ;;  %v493_v10 = vld [vmem:[%s4034_s14 + $0x30] sm:$0xff]  ;;  %v4083_v11 = vld [vmem:[%s4034_s14 + $0x48] sm:$0xff]  ;;  %v495_v12 = vld [vmem:[%s4034_s14 + $0x40] sm:$0xff] }
  0xdc   : > { %v4088_v13 = vld [vmem:[%s4034_s14 + $0x58] sm:$0xff]  ;;  %v4091_v14 = vld [vmem:[%s4034_s14 + $0x50] sm:$0xff]  ;;  %v4096_v15 = vld [vmem:[%s4034_s14 + $0x68] sm:$0xff]  ;;  %s988_s5 = scvt.s32.f32 %s4511_s6 }
  0xdd   : > { %539 = vadd.xlane.f32.xlu1 %v502_v3  ;;  %v4099_v16 = vld [vmem:[%s4034_s14 + $0x60] sm:$0xff]  ;;  %v4104_v17 = vld [vmem:[%s4034_s14 + $0x70] sm:$0xff]  ;;  %vm1295_vm4 = vmand %vm1293_vm2, %vm1294_vm3 }
  0xdf   : > { %509 = vadd.xlane.f32.xlu0 %v487_v4 }
  0xe1   : > { %515 = vadd.xlane.f32.xlu1 %v490_v5 }
  0xe3   : > { %513 = vadd.xlane.f32.xlu0 %v489_v6 }
  0xe5   : > { %519 = vadd.xlane.f32.xlu1 %v492_v7 }
  0xe7   : > { %517 = vadd.xlane.f32.xlu0 %v491_v8 }
  0xe9   : > { %523 = vadd.xlane.f32.xlu1 %v494_v9 }
  0xeb   : > { %521 = vadd.xlane.f32.xlu0 %v493_v10 }
  0xed   : > { %527 = vadd.xlane.f32.xlu1 %v4083_v11 }
  0xef   : > { %525 = vadd.xlane.f32.xlu0 %v495_v12 }
  0xf1   : > { %531 = vadd.xlane.f32.xlu1 %v4088_v13 }
  0xf3   : > { %529 = vadd.xlane.f32.xlu0 %v4091_v14 }
  0xf5   : > { %535 = vadd.xlane.f32.xlu1 %v4096_v15 }
  0xf7   : > { %533 = vadd.xlane.f32.xlu0 %v4099_v16 }
  0xfb   : > { %537 = vadd.xlane.f32.xlu0 %v4104_v17 }
 0x162   : > { %v512_v18 = vpop.xlane.xlu1 %511 }
 0x163   : > { %v543_v19 = vmul.f32 0.0078125, %v512_v18 }
 0x164   : > { %v946_v20 = vpop.xlane.xlu0 %945 }
 0x165   : > { %v4107_v21 = vsub.f32 %v488_v0, %v543_v19  ;;  %v947_v50 = vmul.f32 0.0078125, %v946_v20 }
 0x166   : > { %v540_v22 = vpop.xlane.xlu1 %539 }
 0x167   : > { %v575_v24 = vmul.f32 %v4107_v21, %v4107_v21  ;;  %v557_v25 = vmul.f32 0.0078125, %v540_v22  ;;  %v4142_v59 = vsub.f32 %v4070_v1, %v947_v50 }
 0x168   : > { %v510_v23 = vpop.xlane.xlu0 %509 }
 0x169   : > { %v542_v26 = vmul.f32 0.0078125, %v510_v23  ;;  %592 = vadd.xlane.f32.xlu1 %v575_v24  ;;  %v4113_v28 = vsub.f32 %v502_v3, %v557_v25 }
 0x16a   : > { %v516_v29 = vpop.xlane.xlu1 %515 }
 0x16b   : > { %v4111_v27 = vsub.f32 %v487_v4, %v542_v26  ;;  %v545_v31 = vmul.f32 0.0078125, %v516_v29  ;;  %v589_v36 = vmul.f32 %v4113_v28, %v4113_v28 }
 0x16c   : > { %v514_v30 = vpop.xlane.xlu0 %513 }
 0x16d   : > { %v544_v32 = vmul.f32 0.0078125, %v514_v30  ;;  %v574_v33 = vmul.f32 %v4111_v27, %v4111_v27  ;;  %v4119_v35 = vsub.f32 %v490_v5, %v545_v31  ;;  %v949_v5 = vmul.f32 %v4142_v59, %v4142_v59 }
 0x16e   : > { %v520_v37 = vpop.xlane.xlu1 %519  ;;  %v686_v31 = vlaneseq }
 0x16f   : > { %v4117_v34 = vsub.f32 %v489_v6, %v544_v32  ;;  %590 = vadd.xlane.f32.xlu0 %v574_v33  ;;  %v547_v39 = vmul.f32 0.0078125, %v520_v37  ;;  %v577_v44 = vmul.f32 %v4119_v35, %v4119_v35 }
 0x170   : > { %v518_v38 = vpop.xlane.xlu0 %517  ;;  %v4183_v37 = vshrl.u32 %v686_v31, 7 }
 0x171   : > { %v546_v40 = vmul.f32 0.0078125, %v518_v38  ;;  %v576_v41 = vmul.f32 %v4117_v34, %v4117_v34  ;;  %v4127_v43 = vsub.f32 %v492_v7, %v547_v39 }
 0x172   : > { %v524_v45 = vpop.xlane.xlu1 %523  ;;  %vm1009_vm1 = vcmp.lt.s32.totalorder %v4183_v37, 1 }
 0x173   : > { %v4125_v42 = vsub.f32 %v491_v8, %v546_v40  ;;  %620 = vadd.xlane.f32.xlu0 %v589_v36  ;;  %594 = vadd.xlane.f32.xlu1 %v576_v41  ;;  %v549_v47 = vmul.f32 0.0078125, %v524_v45  ;;  %v579_v53 = vmul.f32 %v4127_v43, %v4127_v43 }
 0x174   : > { %v522_v46 = vpop.xlane.xlu0 %521 }
 0x175   : > { %v548_v48 = vmul.f32 0.0078125, %v522_v46  ;;  %v578_v49 = vmul.f32 %v4125_v42, %v4125_v42  ;;  %v4135_v52 = vsub.f32 %v494_v9, %v549_v47  ;;  %v4186_v46 = vsub.s32 0, %v4183_v37 }
 0x176   : > { %v528_v54 = vpop.xlane.xlu1 %527 }
 0x177   : > { %v4133_v51 = vsub.f32 %v493_v10, %v548_v48  ;;  %596 = vadd.xlane.f32.xlu0 %v577_v44  ;;  %598 = vadd.xlane.f32.xlu1 %v578_v49  ;;  %v551_v56 = vmul.f32 0.0078125, %v528_v54  ;;  %v581_v62 = vmul.f32 %v4135_v52, %v4135_v52  ;;  %v4188_v49 = vld [vmem:[#allocation10] sm:$0x1]  ;;  %v4190_v54 = vld [vmem:[#allocation10 + $0x1] sm:$0x1] }
 0x178   : > { %v526_v55 = vpop.xlane.xlu0 %525 }
 0x179   : > { %v550_v57 = vmul.f32 0.0078125, %v526_v55  ;;  %v580_v58 = vmul.f32 %v4133_v51, %v4133_v51  ;;  %v4147_v61 = vsub.f32 %v4083_v11, %v551_v56 }
 0x17a   : > { %v532_v63 = vpop.xlane.xlu1 %531 }
 0x17b   : > { %v4144_v60 = vsub.f32 %v495_v12, %v550_v57  ;;  %600 = vadd.xlane.f32.xlu0 %v579_v53  ;;  %602 = vadd.xlane.f32.xlu1 %v580_v58  ;;  %v553_v0 = vmul.f32 0.0078125, %v532_v63  ;;  %v583_v7 = vmul.f32 %v4147_v61, %v4147_v61  ;;  %v950_v12 = vsel %vm943_vm0, %v949_v5, 0.0 }
 0x17c   : > { %v530_v2 = vpop.xlane.xlu0 %529  ;;  %v4194_v57 = vrot.slane %v4188_v49, %v4186_v46 }
 0x17d   : > { %v582_v3 = vmul.f32 %v4144_v60, %v4144_v60  ;;  %v552_v4 = vmul.f32 0.0078125, %v530_v2  ;;  %v4154_v1 = vsub.f32 %v4088_v13, %v553_v0  ;;  %v4199_v2 = vrot.slane %v4190_v54, %v4186_v46 }
 0x17e   : > { %v536_v8 = vpop.xlane.xlu1 %535 }
 0x17f   : > { %604 = vadd.xlane.f32.xlu0 %v581_v62  ;;  %606 = vadd.xlane.f32.xlu1 %v582_v3  ;;  %v4159_v6 = vsub.f32 %v4091_v14, %v552_v4  ;;  %v555_v9 = vmul.f32 0.0078125, %v536_v8  ;;  %v585_v13 = vmul.f32 %v4154_v1, %v4154_v1 }
 0x180   : > { %v534_v10 = vpop.xlane.xlu0 %533 }
 0x181   : > { %v554_v11 = vmul.f32 0.0078125, %v534_v10  ;;  %v4167_v18 = vsub.f32 %v4096_v15, %v555_v9  ;;  %v584_v19 = vmul.f32 %v4159_v6, %v4159_v6 }
 0x183   : > { %608 = vadd.xlane.f32.xlu0 %v583_v7  ;;  %951 = vadd.xlane.f32.xlu1 %v950_v12  ;;  %v4170_v14 = vsub.f32 %v4099_v16, %v554_v11  ;;  %v587_v24 = vmul.f32 %v4167_v18, %v4167_v18 }
 0x184   : > { %v538_v20 = vpop.xlane.xlu0 %537 }
 0x185   : > { %v556_v22 = vmul.f32 0.0078125, %v538_v20  ;;  %v586_v15 = vmul.f32 %v4170_v14, %v4170_v14 }
 0x187   : > { %612 = vadd.xlane.f32.xlu0 %v585_v13  ;;  %610 = vadd.xlane.f32.xlu1 %v584_v19  ;;  %v4175_v23 = vsub.f32 %v4104_v17, %v556_v22 }
 0x189   : > { %v588_v16 = vmul.f32 %v4175_v23, %v4175_v23 }
 0x18b   : > { %616 = vadd.xlane.f32.xlu0 %v587_v24  ;;  %614 = vadd.xlane.f32.xlu1 %v586_v15 }
 0x18f   : > { %618 = vadd.xlane.f32.xlu1 %v588_v16 }
 0x1f2   : > { %v593_v25 = vpop.xlane.xlu1 %592 }
 0x1f3   : > { %v623_v26 = vmul.f32 0.0078125, %v593_v25 }
 0x1f5   : > { %v639_v29 = vadd.f32 1e-05, %v623_v26 }
 0x1f7   : > { %3152 = vrsqrt.f32 %v639_v29 }
 0x1f8   : > { %v591_v30 = vpop.xlane.xlu0 %590 }
 0x1f9   : > { %v622_v17 = vmul.f32 0.0078125, %v591_v30 }
 0x1fb   : > { %v638_v32 = vadd.f32 1e-05, %v622_v17 }
 0x1fc   : > { %v595_v33 = vpop.xlane.xlu1 %594  ;;  %v621_v36 = vpop.xlane.xlu0 %620 }
 0x1fd   : > { %3154 = vrsqrt.f32 %v638_v32  ;;  %v624_v38 = vmul.f32 0.0078125, %v595_v33  ;;  %v637_v39 = vmul.f32 0.0078125, %v621_v36 }
 0x1ff   : > { %v640_v40 = vadd.f32 1e-05, %v624_v38  ;;  %v653_v41 = vadd.f32 1e-05, %v637_v39 }
 0x200   : > { %v599_v44 = vpop.xlane.xlu1 %598  ;;  %v597_v45 = vpop.xlane.xlu0 %596 }
 0x201   : > { %3156 = vrsqrt.f32 %v640_v40  ;;  %v626_v47 = vmul.f32 0.0078125, %v599_v44  ;;  %v625_v48 = vmul.f32 0.0078125, %v597_v45 }
 0x202   : > { %3158 = vrsqrt.f32 %v653_v41 }
 0x203   : > { %v642_v50 = vadd.f32 1e-05, %v626_v47  ;;  %v641_v53 = vadd.f32 1e-05, %v625_v48 }
 0x204   : > { %v603_v55 = vpop.xlane.xlu1 %602  ;;  %v601_v56 = vpop.xlane.xlu0 %600 }
 0x205   : > { %v3153_v58 = vpop.eup %3152  ;;  %3160 = vrsqrt.f32 %v642_v50  ;;  %v628_v62 = vmul.f32 0.0078125, %v603_v55  ;;  %v627_v63 = vmul.f32 0.0078125, %v601_v56 }
 0x206   : > { %3162 = vrsqrt.f32 %v641_v53  ;;  %v671_v0 = vmul.f32 %v3153_v58, %v4107_v21 }
 0x207   : > { %v644_v3 = vadd.f32 1e-05, %v628_v62  ;;  %v643_v4 = vadd.f32 1e-05, %v627_v63 }
 0x208   : > { %v607_v5 = vpop.xlane.xlu1 %606  ;;  %v605_v7 = vpop.xlane.xlu0 %604  ;;  %v691_v8 = vmul.f32 %v4194_v57, %v671_v0 }
 0x209   : > { %3164 = vrsqrt.f32 %v644_v3  ;;  %v630_v9 = vmul.f32 0.0078125, %v607_v5  ;;  %v629_v10 = vmul.f32 0.0078125, %v605_v7 }
 0x20a   : > { %v3155_v11 = vpop.eup %3154  ;;  %3166 = vrsqrt.f32 %v643_v4  ;;  %v4203_v12 = vadd.f32 %v4199_v2, %v691_v8 }
 0x20b   : > { %v646_v13 = vadd.f32 1e-05, %v630_v9  ;;  %v645_v21 = vadd.f32 1e-05, %v629_v10  ;;  %v670_v19 = vmul.f32 %v3155_v11, %v4111_v27 }
 0x20c   : > { %v952_v20 = vpop.xlane.xlu1 %951  ;;  %1318 = vst [vmem:[#allocation4] sm:$0xff] %v4203_v12  ;;  %728 = vadd.xlane.f32.xlu1 %v4203_v12  ;;  %v609_v22 = vpop.xlane.xlu0 %608 }
 0x20d   : > { %3168 = vrsqrt.f32 %v646_v13  ;;  %v953_v24 = vmul.f32 0.0078125, %v952_v20  ;;  %v631_v15 = vmul.f32 0.0078125, %v609_v22  ;;  %v690_v16 = vmul.f32 %v4194_v57, %v670_v19 }
 0x20e   : > { %v3157_v25 = vpop.eup %3156  ;;  %3170 = vrsqrt.f32 %v645_v21 }
 0x20f   : > { %v3159_v26 = vpop.eup %3158  ;;  %v954_v29 = vadd.f32 1e-05, %v953_v24  ;;  %v647_v30 = vadd.f32 1e-05, %v631_v15  ;;  %v4210_v31 = vadd.f32 %v4199_v2, %v690_v16  ;;  %v672_v27 = vmul.f32 %v3157_v25, %v4117_v34 }
 0x210   : > { %v611_v17 = vpop.xlane.xlu1 %610  ;;  %v613_v32 = vpop.xlane.xlu0 %612  ;;  %v685_v33 = vmul.f32 %v3159_v26, %v4113_v28  ;;  %v958_v16 = vrot.slane %v4188_v49, 1 }
 0x211   : > { %3172 = vrsqrt.f32 %v954_v29  ;;  %v632_v36 = vmul.f32 0.0078125, %v611_v17  ;;  %v633_v38 = vmul.f32 0.0078125, %v613_v32  ;;  %726 = vadd.xlane.f32.xlu0 %v4210_v31  ;;  %1317 = vst [vmem:[#allocation4 + $0x30] sm:$0xff] %v4210_v31  ;;  %v692_v39 = vmul.f32 %v4194_v57, %v672_v27 }
 0x212   : > { %v3161_v40 = vpop.eup %3160  ;;  %3174 = vrsqrt.f32 %v647_v30  ;;  %v705_v41 = vmul.f32 %v4194_v57, %v685_v33  ;;  %v962_v30 = vrot.slane %v4190_v54, 1 }
 0x213   : > { %v3163_v44 = vpop.eup %3162  ;;  %v648_v45 = vadd.f32 1e-05, %v632_v36  ;;  %v649_v34 = vadd.f32 1e-05, %v633_v38  ;;  %v4219_v47 = vadd.f32 %v4199_v2, %v692_v39  ;;  %v674_v28 = vmul.f32 %v3161_v40, %v4125_v42 }
 0x214   : > { %v615_v48 = vpop.xlane.xlu1 %614  ;;  %v617_v50 = vpop.xlane.xlu0 %616  ;;  %v4223_v53 = vadd.f32 %v4199_v2, %v705_v41  ;;  %v673_v55 = vmul.f32 %v3163_v44, %v4119_v35 }
 0x215   : > { %3176 = vrsqrt.f32 %v648_v45  ;;  %v634_v56 = vmul.f32 0.0078125, %v615_v48  ;;  %v635_v58 = vmul.f32 0.0078125, %v617_v50  ;;  %1319 = vst [vmem:[#allocation4 + $0x58] sm:$0xff] %v4219_v47  ;;  %v694_v62 = vmul.f32 %v4194_v57, %v674_v28 }
 0x216   : > { %v3165_v63 = vpop.eup %3164  ;;  %3178 = vrsqrt.f32 %v649_v34  ;;  %756 = vadd.xlane.f32.xlu0 %v4223_v53  ;;  %1332 = vst [vmem:[#allocation4 + $0x28] sm:$0xff] %v4223_v53  ;;  %v693_v42 = vmul.f32 %v4194_v57, %v673_v55 }
 0x217   : > { %v3167_v0 = vpop.eup %3166  ;;  %v650_v3 = vadd.f32 1e-05, %v634_v56  ;;  %v651_v4 = vadd.f32 1e-05, %v635_v58  ;;  %v4232_v35 = vadd.f32 %v4199_v2, %v694_v62  ;;  %v676_v5 = vmul.f32 %v3165_v63, %v4133_v51 }
 0x218   : > { %v619_v7 = vpop.xlane.xlu1 %618  ;;  %v4236_v8 = vadd.f32 %v4199_v2, %v693_v42  ;;  %v675_v9 = vmul.f32 %v3167_v0, %v4127_v43 }
 0x219   : > { %3180 = vrsqrt.f32 %v650_v3  ;;  %v636_v10 = vmul.f32 0.0078125, %v619_v7  ;;  %1321 = vst [vmem:[#allocation4 + $0x50] sm:$0xff] %v4232_v35  ;;  %v696_v11 = vmul.f32 %v4194_v57, %v676_v5 }
 0x21a   : > { %v3169_v13 = vpop.eup %3168  ;;  %3182 = vrsqrt.f32 %v651_v4  ;;  %730 = vadd.xlane.f32.xlu0 %v4219_v47  ;;  %732 = vadd.xlane.f32.xlu1 %v4236_v8  ;;  %1320 = vst [vmem:[#allocation4 + $0x18] sm:$0xff] %v4236_v8  ;;  %v695_v51 = vmul.f32 %v4194_v57, %v675_v9 }
 0x21b   : > { %v3171_v21 = vpop.eup %3170  ;;  %v652_v19 = vadd.f32 1e-05, %v636_v10  ;;  %v4246_v43 = vadd.f32 %v4199_v2, %v696_v11  ;;  %v678_v20 = vmul.f32 %v3169_v13, %v4144_v60 }
 0x21c   : > { %v4250_v22 = vadd.f32 %v4199_v2, %v695_v51  ;;  %v677_v24 = vmul.f32 %v3171_v21, %v4135_v52 }
 0x21d   : > { %3184 = vrsqrt.f32 %v652_v19  ;;  %1323 = vst [vmem:[#allocation4 + $0x8] sm:$0xff] %v4246_v43  ;;  %v698_v15 = vmul.f32 %v4194_v57, %v678_v20 }
 0x21e   : > { %v3173_v25 = vpop.eup %3172  ;;  %734 = vadd.xlane.f32.xlu0 %v4232_v35  ;;  %736 = vadd.xlane.f32.xlu1 %v4250_v22  ;;  %1322 = vst [vmem:[#allocation4 + $0x68] sm:$0xff] %v4250_v22  ;;  %v697_v60 = vmul.f32 %v4194_v57, %v677_v24 }
 0x21f   : > { %v3175_v26 = vpop.eup %3174  ;;  %v4261_v29 = vadd.f32 %v4199_v2, %v698_v15  ;;  %v956_v52 = vmul.f32 %v3173_v25, %v4142_v59 }
 0x220   : > { %v4266_v27 = vadd.f32 %v4199_v2, %v697_v60  ;;  %v679_v49 = vmul.f32 %v3175_v26, %v4147_v61 }
 0x221   : > { %1325 = vst [vmem:[#allocation4 + $0x40] sm:$0xff] %v4261_v29  ;;  %v960_v17 = vmul.f32 %v958_v16, %v956_v52 }
 0x222   : > { %v3177_v32 = vpop.eup %3176  ;;  %738 = vadd.xlane.f32.xlu0 %v4246_v43  ;;  %740 = vadd.xlane.f32.xlu1 %v4266_v27  ;;  %1324 = vst [vmem:[#allocation4 + $0x48] sm:$0xff] %v4266_v27  ;;  %v699_v33 = vmul.f32 %v4194_v57, %v679_v49 }
 0x223   : > { %v3179_v59 = vpop.eup %3178  ;;  %v4274_v36 = vadd.f32 %v962_v30, %v960_v17  ;;  %v680_v54 = vmul.f32 %v3177_v32, %v4159_v6 }
 0x224   : > { %v4278_v38 = vadd.f32 %v4199_v2, %v699_v33  ;;  %v681_v61 = vmul.f32 %v3179_v59, %v4154_v1 }
 0x225   : > { %v965_v39 = vsel %vm943_vm0, %v4274_v36, 0.0  ;;  %v700_v40 = vmul.f32 %v4194_v57, %v680_v54 }
 0x226   : > { %v3181_v41 = vpop.eup %3180  ;;  %742 = vadd.xlane.f32.xlu0 %v4261_v29  ;;  %966 = vadd.xlane.f32.xlu1 %v965_v39  ;;  %1326 = vst [vmem:[#allocation4 + $0x20] sm:$0xff] %v4278_v38  ;;  %v701_v44 = vmul.f32 %v4194_v57, %v681_v61 }
 0x227   : > { %v3183_v45 = vpop.eup %3182  ;;  %v4288_v6 = vadd.f32 %v4199_v2, %v700_v40  ;;  %v682_v34 = vmul.f32 %v3181_v41, %v4170_v14 }
 0x228   : > { %v4292_v1 = vadd.f32 %v4199_v2, %v701_v44  ;;  %v683_v28 = vmul.f32 %v3183_v45, %v4167_v18 }
 0x229   : > { %1327 = vst [vmem:[#allocation4 + $0x10] sm:$0xff] %v4288_v6  ;;  %v702_v48 = vmul.f32 %v4194_v57, %v682_v34 }
 0x22a   : > { %v3185_v50 = vpop.eup %3184  ;;  %746 = vadd.xlane.f32.xlu0 %v4288_v6  ;;  %744 = vadd.xlane.f32.xlu1 %v4278_v38  ;;  %1328 = vst [vmem:[#allocation4 + $0x38] sm:$0xff] %v4292_v1  ;;  %v703_v55 = vmul.f32 %v4194_v57, %v683_v28 }
 0x22b   : > { %v4302_v14 = vadd.f32 %v4199_v2, %v702_v48  ;;  %v684_v56 = vmul.f32 %v3185_v50, %v4175_v23 }
 0x22c   : > { %v4306_v18 = vadd.f32 %v4199_v2, %v703_v55 }
 0x22d   : > { %1329 = vst [vmem:[#allocation4 + $0x60] sm:$0xff] %v4302_v14  ;;  %v704_v58 = vmul.f32 %v4194_v57, %v684_v56 }
 0x22e   : > { %750 = vadd.xlane.f32.xlu0 %v4302_v14  ;;  %748 = vadd.xlane.f32.xlu1 %v4292_v1  ;;  %1330 = vst [vmem:[#allocation4 + $0x70] sm:$0xff] %v4306_v18 }
 0x22f   : > { %v4314_v62 = vadd.f32 %v4199_v2, %v704_v58 }
 0x231   : > { %1331 = vst [vmem:[#allocation4 + $0x78] sm:$0xff] %v4314_v62 }
 0x232   : > { %754 = vadd.xlane.f32.xlu0 %v4314_v62  ;;  %752 = vadd.xlane.f32.xlu1 %v4306_v18 }
 0x295   : > { %v729_v23 = vpop.xlane.xlu1 %728 }
 0x296   : > { %v759_v63 = vmul.f32 0.0078125, %v729_v23 }
 0x298   : > { %v4320_v42 = vsub.f32 %v4203_v12, %v759_v63 }
 0x29a   : > { %v727_v57 = vpop.xlane.xlu0 %726  ;;  %v791_v0 = vmul.f32 %v4320_v42, %v4320_v42 }
 0x29b   : > { %v758_v3 = vmul.f32 0.0078125, %v727_v57 }
 0x29c   : > { %808 = vadd.xlane.f32.xlu0 %v791_v0 }
 0x29d   : > { %v4325_v2 = vsub.f32 %v4210_v31, %v758_v3 }
 0x29f   : > { %v757_v4 = vpop.xlane.xlu0 %756  ;;  %v790_v5 = vmul.f32 %v4325_v2, %v4325_v2 }
 0x2a0   : > { %v773_v7 = vmul.f32 0.0078125, %v757_v4 }
 0x2a1   : > { %806 = vadd.xlane.f32.xlu1 %v790_v5 }
 0x2a2   : > { %v4330_v9 = vsub.f32 %v4223_v53, %v773_v7 }
 0x2a3   : > { %v733_v12 = vpop.xlane.xlu1 %732  ;;  %v731_v10 = vpop.xlane.xlu0 %730 }
 0x2a4   : > { %v761_v11 = vmul.f32 0.0078125, %v733_v12  ;;  %v760_v13 = vmul.f32 0.0078125, %v731_v10  ;;  %v805_v51 = vmul.f32 %v4330_v9, %v4330_v9 }
 0x2a6   : > { %v4335_v21 = vsub.f32 %v4236_v8, %v761_v11  ;;  %v4338_v31 = vsub.f32 %v4219_v47, %v760_v13  ;;  %836 = vadd.xlane.f32.xlu1 %v805_v51 }
 0x2a7   : > { %v737_v19 = vpop.xlane.xlu1 %736  ;;  %v735_v20 = vpop.xlane.xlu0 %734 }
 0x2a8   : > { %v763_v24 = vmul.f32 0.0078125, %v737_v19  ;;  %v762_v15 = vmul.f32 0.0078125, %v735_v20  ;;  %v793_v53 = vmul.f32 %v4335_v21, %v4335_v21  ;;  %v792_v16 = vmul.f32 %v4338_v31, %v4338_v31 }
 0x2aa   : > { %v4345_v25 = vsub.f32 %v4250_v22, %v763_v24  ;;  %v4348_v8 = vsub.f32 %v4232_v35, %v762_v15  ;;  %812 = vadd.xlane.f32.xlu0 %v793_v53  ;;  %810 = vadd.xlane.f32.xlu1 %v792_v16  ;;  %v4405_v16 = vld [vmem:[#allocation10 + $0x2] sm:$0x1] }
 0x2ab   : > { %v741_v47 = vpop.xlane.xlu1 %740  ;;  %v739_v60 = vpop.xlane.xlu0 %738 }
 0x2ac   : > { %v765_v26 = vmul.f32 0.0078125, %v741_v47  ;;  %v764_v52 = vmul.f32 0.0078125, %v739_v60  ;;  %v795_v30 = vmul.f32 %v4345_v25, %v4345_v25  ;;  %v794_v49 = vmul.f32 %v4348_v8, %v4348_v8 }
 0x2ae   : > { %v4355_v17 = vsub.f32 %v4266_v27, %v765_v26  ;;  %v4358_v22 = vsub.f32 %v4246_v43, %v764_v52  ;;  %816 = vadd.xlane.f32.xlu0 %v795_v30  ;;  %814 = vadd.xlane.f32.xlu1 %v794_v49  ;;  %v4409_v49 = vrot.slane %v4405_v16, %v4186_v46 }
 0x2af   : > { %v743_v35 = vpop.xlane.xlu0 %742  ;;  %v967_v32 = vpop.xlane.xlu1 %966 }
 0x2b0   : > { %v766_v33 = vmul.f32 0.0078125, %v743_v35  ;;  %v797_v59 = vmul.f32 %v4355_v17, %v4355_v17  ;;  %v796_v54 = vmul.f32 %v4358_v22, %v4358_v22  ;;  %v968_v61 = vmul.f32 0.0078125, %v967_v32 }
 0x2b2   : > { %v4365_v39 = vsub.f32 %v4261_v29, %v766_v33  ;;  %820 = vadd.xlane.f32.xlu0 %v797_v59  ;;  %818 = vadd.xlane.f32.xlu1 %v796_v54  ;;  %v4370_v45 = vsub.f32 %v4274_v36, %v968_v61  ;;  %v4411_v33 = vld [vmem:[#allocation10 + $0x3] sm:$0x1] }
 0x2b3   : > { %v747_v27 = vpop.xlane.xlu0 %746  ;;  %v745_v43 = vpop.xlane.xlu1 %744 }
 0x2b4   : > { %v768_v40 = vmul.f32 0.0078125, %v747_v27  ;;  %v767_v41 = vmul.f32 0.0078125, %v745_v43  ;;  %v798_v44 = vmul.f32 %v4365_v39, %v4365_v39  ;;  %v970_v36 = vmul.f32 %v4370_v45, %v4370_v45 }
 0x2b6   : > { %v4373_v34 = vsub.f32 %v4288_v6, %v768_v40  ;;  %v4376_v28 = vsub.f32 %v4278_v38, %v767_v41  ;;  %822 = vadd.xlane.f32.xlu1 %v798_v44  ;;  %v971_v4 = vsel %vm943_vm0, %v970_v36, 0.0  ;;  %v4416_v40 = vrot.slane %v4411_v33, %v4186_v46 }
 0x2b7   : > { %v751_v29 = vpop.xlane.xlu0 %750  ;;  %v749_v48 = vpop.xlane.xlu1 %748 }
 0x2b8   : > { %v770_v50 = vmul.f32 0.0078125, %v751_v29  ;;  %v769_v55 = vmul.f32 0.0078125, %v749_v48  ;;  %v800_v56 = vmul.f32 %v4373_v34, %v4373_v34  ;;  %v799_v58 = vmul.f32 %v4376_v28, %v4376_v28 }
 0x2ba   : > { %v4385_v6 = vsub.f32 %v4302_v14, %v770_v50  ;;  %826 = vadd.xlane.f32.xlu1 %v800_v56  ;;  %824 = vadd.xlane.f32.xlu0 %v799_v58  ;;  %v4388_v63 = vsub.f32 %v4292_v1, %v769_v55 }
 0x2bb   : > { %v755_v38 = vpop.xlane.xlu0 %754  ;;  %v753_v23 = vpop.xlane.xlu1 %752 }
 0x2bc   : > { %v772_v57 = vmul.f32 0.0078125, %v755_v38  ;;  %v771_v0 = vmul.f32 0.0078125, %v753_v23  ;;  %v802_v3 = vmul.f32 %v4385_v6, %v4385_v6  ;;  %v801_v1 = vmul.f32 %v4388_v63, %v4388_v63 }
 0x2be   : > { %v4394_v5 = vsub.f32 %v4314_v62, %v772_v57  ;;  %830 = vadd.xlane.f32.xlu1 %v802_v3  ;;  %972 = vadd.xlane.f32.xlu0 %v971_v4  ;;  %v4397_v14 = vsub.f32 %v4306_v18, %v771_v0  ;;  %v4422_v57 = vld [vmem:[#allocation10 + $0x4] sm:$0x1]  ;;  %v4424_v4 = vld [vmem:[#allocation10 + $0x5] sm:$0x1] }
 0x2c0   : > { %v804_v7 = vmul.f32 %v4394_v5, %v4394_v5  ;;  %v803_v12 = vmul.f32 %v4397_v14, %v4397_v14 }
 0x2c2   : > { %834 = vadd.xlane.f32.xlu1 %v804_v7  ;;  %828 = vadd.xlane.f32.xlu0 %v801_v1 }
 0x2c6   : > { %832 = vadd.xlane.f32.xlu0 %v803_v12 }
 0x325   : > { %v809_v10 = vpop.xlane.xlu0 %808 }
 0x326   : > { %v839_v62 = vmul.f32 0.0078125, %v809_v10  ;;  %v4433_v10 = vrot.slane %v4422_v57, %v4186_v46 }
 0x328   : > { %v855_v11 = vadd.f32 1e-05, %v839_v62 }
 0x32a   : > { %3186 = vrsqrt.f32 %v855_v11  ;;  %v807_v13 = vpop.xlane.xlu1 %806 }
 0x32b   : > { %v838_v51 = vmul.f32 0.0078125, %v807_v13 }
 0x32d   : > { %v854_v18 = vadd.f32 1e-05, %v838_v51  ;;  %v4438_v51 = vrot.slane %v4424_v4, %v4186_v46 }
 0x32f   : > { %3188 = vrsqrt.f32 %v854_v18  ;;  %v837_v19 = vpop.xlane.xlu1 %836 }
 0x330   : > { %v853_v20 = vmul.f32 0.0078125, %v837_v19 }
 0x332   : > { %v869_v24 = vadd.f32 1e-05, %v853_v20 }
 0x333   : > { %v811_v15 = vpop.xlane.xlu1 %810  ;;  %v813_v53 = vpop.xlane.xlu0 %812 }
 0x334   : > { %3190 = vrsqrt.f32 %v869_v24  ;;  %v840_v47 = vmul.f32 0.0078125, %v811_v15  ;;  %v841_v60 = vmul.f32 0.0078125, %v813_v53 }
 0x336   : > { %v856_v26 = vadd.f32 1e-05, %v840_v47  ;;  %v857_v52 = vadd.f32 1e-05, %v841_v60 }
 0x337   : > { %v3187_v30 = vpop.eup %3186  ;;  %v815_v35 = vpop.xlane.xlu1 %814 }
 0x338   : > { %v817_v32 = vpop.xlane.xlu0 %816  ;;  %v887_v59 = vmul.f32 %v3187_v30, %v4320_v42  ;;  %3192 = vrsqrt.f32 %v856_v26  ;;  %v842_v54 = vmul.f32 0.0078125, %v815_v35 }
 0x339   : > { %v843_v61 = vmul.f32 0.0078125, %v817_v32  ;;  %3194 = vrsqrt.f32 %v857_v52 }
 0x33a   : > { %v858_v27 = vadd.f32 1e-05, %v842_v54  ;;  %v907_v41 = vmul.f32 %v4409_v49, %v887_v59 }
 0x33b   : > { %v859_v43 = vadd.f32 1e-05, %v843_v61  ;;  %v819_v44 = vpop.xlane.xlu1 %818 }
 0x33c   : > { %v821_v29 = vpop.xlane.xlu0 %820  ;;  %v3189_v48 = vpop.eup %3188  ;;  %3196 = vrsqrt.f32 %v858_v27  ;;  %v844_v50 = vmul.f32 0.0078125, %v819_v44  ;;  %v927_v58 = vadd.f32 %v4416_v40, %v907_v41 }
 0x33d   : > { %v845_v55 = vmul.f32 0.0078125, %v821_v29  ;;  %v886_v42 = vmul.f32 %v3189_v48, %v4325_v2  ;;  %3198 = vrsqrt.f32 %v859_v43 }
 0x33e   : > { %v860_v56 = vadd.f32 1e-05, %v844_v50  ;;  %v992_v12 = vrot.slane %v927_v58, 7 }
 0x33f   : > { %v906_v36 = vmul.f32 %v4409_v49, %v886_v42  ;;  %v861_v38 = vadd.f32 1e-05, %v845_v55  ;;  %v823_v23 = vpop.xlane.xlu1 %822 }
 0x340   : > { %3200 = vrsqrt.f32 %v860_v56  ;;  %v846_v0 = vmul.f32 0.0078125, %v823_v23 }
 0x341   : > { %v3191_v3 = vpop.eup %3190  ;;  %v4427_v7 = vadd.f32 %v4416_v40, %v906_v36  ;;  %3202 = vrsqrt.f32 %v861_v38 }
 0x342   : > { %v901_v2 = vmul.f32 %v3191_v3, %v4330_v9  ;;  %v862_v1 = vadd.f32 1e-05, %v846_v0 }
 0x343   : > { %v991_v62 = vrot.slane %v4427_v7, 7  ;;  %v827_v11 = vpop.xlane.xlu1 %826  ;;  %v825_v13 = vpop.xlane.xlu0 %824 }
 0x344   : > { %v921_v18 = vmul.f32 %v4409_v49, %v901_v2  ;;  %v848_v19 = vmul.f32 0.0078125, %v827_v11  ;;  %v847_v20 = vmul.f32 0.0078125, %v825_v13  ;;  %3204 = vrsqrt.f32 %v862_v1 }
 0x345   : > { %v3193_v9 = vpop.eup %3192  ;;  %v1024_v24 = vsel %vm1009_vm1, %v991_v62, %v992_v12 }
 0x346   : > { %v3195_v15 = vpop.eup %3194  ;;  %v1027_v53 = vsub.f32 %v927_v58, %v1024_v24  ;;  %v4444_v47 = vadd.f32 %v4416_v40, %v921_v18  ;;  %v888_v60 = vmul.f32 %v3193_v9, %v4338_v31  ;;  %v864_v26 = vadd.f32 1e-05, %v848_v19 }
 0x347   : > { %v889_v46 = vmul.f32 %v3195_v15, %v4335_v21  ;;  %v863_v52 = vadd.f32 1e-05, %v847_v20  ;;  %v831_v30 = vpop.xlane.xlu1 %830  ;;  %v973_v35 = vpop.xlane.xlu0 %972 }
 0x348   : > { %v1047_v32 = vmul.f32 %v4433_v10, %v1027_v53  ;;  %v1163_v59 = vmul.f32 %v4438_v51, %v1027_v53  ;;  %v1006_v54 = vrot.slane %v4444_v47, 7  ;;  %v908_v61 = vmul.f32 %v4409_v49, %v888_v60 }
 0x349   : > { %v3197_v27 = vpop.eup %3196  ;;  %v909_v43 = vmul.f32 %v4409_v49, %v889_v46  ;;  %3206 = vrsqrt.f32 %v864_v26  ;;  %v4458_v44 = vmul.f32 0.0078125, %v831_v30  ;;  %v974_v29 = vmul.f32 0.0078125, %v973_v35 }
 0x34a   : > { %v3199_v41 = vpop.eup %3198  ;;  %v1025_v21 = vsel %vm1009_vm1, %v1006_v54, %v991_v62  ;;  %v928_v31 = vadd.f32 %v4416_v40, %v908_v61  ;;  %v890_v55 = vmul.f32 %v3197_v27, %v4348_v8  ;;  %v1063_v56 = vadd.f32 %v1047_v32, %v1024_v24 }
 0x34b   : > { %v1026_v48 = vsub.f32 %v4427_v7, %v1025_v21  ;;  %v929_v50 = vadd.f32 %v4416_v40, %v909_v43  ;;  %v891_v42 = vmul.f32 %v3199_v41, %v4345_v25  ;;  %v1179_v58 = vadd.f32 %v1163_v59, %v1024_v24 }
 0x34c   : > { %v993_v36 = vrot.slane %v928_v31, 7  ;;  %3208 = vrsqrt.f32 %v863_v52  ;;  %v910_v2 = vmul.f32 %v4409_v49, %v890_v55  ;;  %v975_v25 = vadd.f32 1e-05, %v974_v29 }
 0x34d   : > { %v3201_v38 = vpop.eup %3200  ;;  %v1046_v23 = vmul.f32 %v4433_v10, %v1026_v48  ;;  %v1162_v0 = vmul.f32 %v4438_v51, %v1026_v48  ;;  %v994_v3 = vrot.slane %v929_v50, 7  ;;  %v911_v62 = vmul.f32 %v4409_v49, %v891_v42 }
 0x34e   : > { %v1023_v1 = vsel %vm1009_vm1, %v992_v12, %v993_v36  ;;  %v892_v8 = vmul.f32 %v3201_v38, %v4358_v22  ;;  %v3203_v20 = vpop.eup %3202  ;;  %v930_v24 = vadd.f32 %v4416_v40, %v910_v2  ;;  %3210 = vrsqrt.f32 %v975_v25 }
 0x34f   : > { %v1062_v11 = vadd.f32 %v1046_v23, %v1025_v21  ;;  %v1178_v13 = vadd.f32 %v1162_v0, %v1025_v21  ;;  %v1028_v18 = vsub.f32 %v928_v31, %v1023_v1  ;;  %v1022_v19 = vsel %vm1009_vm1, %v993_v36, %v994_v3 }
 0x350   : > { %v1029_v9 = vsub.f32 %v929_v50, %v1022_v19  ;;  %v931_v15 = vadd.f32 %v4416_v40, %v911_v62  ;;  %v912_v53 = vmul.f32 %v4409_v49, %v892_v8  ;;  %v995_v35 = vrot.slane %v930_v24, 7  ;;  %v835_v8 = vpop.xlane.xlu1 %834 }
 0x351   : > { %v2675_v12 = vpack.c.bf16 %v1063_v56, %v1062_v11  ;;  %v2715_v60 = vpack.c.bf16 %v1179_v58, %v1178_v13  ;;  %v1048_v26 = vmul.f32 %v4433_v10, %v1028_v18  ;;  %v1164_v22 = vmul.f32 %v4438_v51, %v1028_v18  ;;  %v3205_v46 = vpop.eup %3204 }
 0x352   : > { %v1049_v52 = vmul.f32 %v4433_v10, %v1029_v9  ;;  %v1165_v30 = vmul.f32 %v4438_v51, %v1029_v9  ;;  %v996_v32 = vrot.slane %v931_v15, 7  ;;  %v932_v27 = vadd.f32 %v4416_v40, %v912_v53 }
 0x353   : > { %2676 = vst [vmem:[#allocation2] sm:$0xff] %v2675_v12   ;;  %2716 = vst [vmem:[#allocation3] sm:$0xff] %v2715_v60   ;;  %v1064_v59 = vadd.f32 %v1048_v26, %v1023_v1  ;;  %v1180_v61 = vadd.f32 %v1164_v22, %v1023_v1  ;;  %v893_v43 = vmul.f32 %v3203_v20, %v4355_v17  ;;  %v829_v20 = vpop.xlane.xlu0 %828  ;;  %v852_v26 = vmul.f32 0.0078125, %v835_v8 }
 0x354   : > { %v1065_v41 = vadd.f32 %v1049_v52, %v1022_v19  ;;  %v1181_v21 = vadd.f32 %v1165_v30, %v1022_v19  ;;  %v1021_v31 = vsel %vm1009_vm1, %v994_v3, %v995_v35  ;;  %v1020_v29 = vsel %vm1009_vm1, %v995_v35, %v996_v32 }
 0x355   : > { %v1030_v48 = vsub.f32 %v930_v24, %v1021_v31  ;;  %v1031_v50 = vsub.f32 %v931_v15, %v1020_v29  ;;  %v997_v55 = vrot.slane %v932_v27, 7  ;;  %v913_v42 = vmul.f32 %v4409_v49, %v893_v43 }
 0x356   : > { %v3207_v56 = vpop.eup %3206  ;;  %v2680_v58 = vpack.c.bf16 %v1065_v41, %v1064_v59  ;;  %v2720_v36 = vpack.c.bf16 %v1181_v21, %v1180_v61  ;;  %v894_v38 = vmul.f32 %v3205_v46, %v4365_v39  ;;  %v866_v39 = vadd.f32 1e-05, %v4458_v44 }
 0x357   : > { %v1050_v17 = vmul.f32 %v4433_v10, %v1030_v48  ;;  %v1166_v23 = vmul.f32 %v4438_v51, %v1030_v48  ;;  %v1051_v0 = vmul.f32 %v4433_v10, %v1031_v50  ;;  %v1167_v3 = vmul.f32 %v4438_v51, %v1031_v50  ;;  %v833_v41 = vpop.xlane.xlu0 %832 }
 0x358   : > { %2792 = vst [vmem:[#allocation2 + $0x8] sm:$0xff] %v2680_v58   ;;  %2799 = vst [vmem:[#allocation3 + $0x8] sm:$0xff] %v2720_v36   ;;  %v1019_v2 = vsel %vm1009_vm1, %v996_v32, %v997_v55  ;;  %v933_v1 = vadd.f32 %v4416_v40, %v913_v42  ;;  %v914_v62 = vmul.f32 %v4409_v49, %v894_v38  ;;  %3212 = vrsqrt.f32 %v866_v39 }
 0x359   : > { %v3209_v25 = vpop.eup %3208  ;;  %v1066_v11 = vadd.f32 %v1050_v17, %v1021_v31  ;;  %v1182_v13 = vadd.f32 %v1166_v23, %v1021_v31  ;;  %v1067_v18 = vadd.f32 %v1051_v0, %v1020_v29  ;;  %v1183_v19 = vadd.f32 %v1167_v3, %v1020_v29 }
 0x35a   : > { %v1032_v9 = vsub.f32 %v932_v27, %v1019_v2  ;;  %v998_v24 = vrot.slane %v933_v1, 7  ;;  %v934_v15 = vadd.f32 %v4416_v40, %v914_v62  ;;  %v895_v60 = vmul.f32 %v3209_v25, %v4376_v28 }
 0x35b   : > { %v2685_v53 = vpack.c.bf16 %v1067_v18, %v1066_v11  ;;  %v2725_v12 = vpack.c.bf16 %v1183_v19, %v1182_v13  ;;  %v868_v32 = vadd.f32 1e-05, %v852_v26  ;;  %v849_v29 = vmul.f32 0.0078125, %v829_v20  ;;  %v3211_v17 = vpop.eup %3210 }
 0x35c   : > { %v1052_v44 = vmul.f32 %v4433_v10, %v1032_v9  ;;  %v1168_v22 = vmul.f32 %v4438_v51, %v1032_v9  ;;  %v1018_v46 = vsel %vm1009_vm1, %v997_v55, %v998_v24  ;;  %v999_v52 = vrot.slane %v934_v15, 7 }
 0x35d   : > { %2793 = vst [vmem:[#allocation2 + $0x10] sm:$0xff] %v2685_v53   ;;  %2800 = vst [vmem:[#allocation3 + $0x10] sm:$0xff] %v2725_v12   ;;  %v1033_v30 = vsub.f32 %v933_v1, %v1018_v46  ;;  %v915_v35 = vmul.f32 %v4409_v49, %v895_v60  ;;  %3214 = vrsqrt.f32 %v868_v32  ;;  %v979_v55 = vrot.slane %v4405_v16, 1 }
 0x35e   : > { %v1017_v28 = vsel %vm1009_vm1, %v998_v24, %v999_v52  ;;  %v1068_v59 = vadd.f32 %v1052_v44, %v1019_v2  ;;  %v1184_v61 = vadd.f32 %v1168_v22, %v1019_v2  ;;  %v896_v42 = vmul.f32 %v3207_v56, %v4373_v34 }
 0x35f   : > { %v1053_v27 = vmul.f32 %v4433_v10, %v1033_v30  ;;  %v1169_v43 = vmul.f32 %v4438_v51, %v1033_v30  ;;  %v1034_v21 = vsub.f32 %v934_v15, %v1017_v28  ;;  %v935_v31 = vadd.f32 %v4416_v40, %v915_v35 }
 0x360   : > { %v865_v36 = vadd.f32 1e-05, %v849_v29  ;;  %v851_v38 = vmul.f32 0.0078125, %v833_v41  ;;  %v983_v1 = vrot.slane %v4411_v33, 1  ;;  %v977_v62 = vmul.f32 %v3211_v17, %v4370_v45 }
 0x361   : > { %v1069_v48 = vadd.f32 %v1053_v27, %v1018_v46  ;;  %v1185_v50 = vadd.f32 %v1169_v43, %v1018_v46  ;;  %v1000_v58 = vrot.slane %v935_v31, 7  ;;  %v1054_v3 = vmul.f32 %v4433_v10, %v1034_v21 }
 0x362   : > { %v1170_v34 = vmul.f32 %v4438_v51, %v1034_v21  ;;  %3216 = vrsqrt.f32 %v865_v36  ;;  %v867_v56 = vadd.f32 1e-05, %v851_v38  ;;  %v916_v39 = vmul.f32 %v4409_v49, %v896_v42 }
 0x363   : > { %v2690_v23 = vpack.c.bf16 %v1069_v48, %v1068_v59  ;;  %v2730_v0 = vpack.c.bf16 %v1185_v50, %v1184_v61  ;;  %v1016_v2 = vsel %vm1009_vm1, %v999_v52, %v1000_v58  ;;  %v981_v8 = vmul.f32 %v979_v55, %v977_v62  ;;  %v1296_v62 = vld [vmem:[#allocation2] sm:$0x1] }
 0x364   : > { %v1035_v16 = vsub.f32 %v935_v31, %v1016_v2  ;;  %v989_v13 = vstv %s988_s5  ;;  %3218 = vrsqrt.f32 %v867_v56  ;;  %v1070_v33 = vadd.f32 %v1054_v3, %v1017_v28 }
 0x365   : > { %2794 = vst [vmem:[#allocation2 + $0x18] sm:$0xff] %v2690_v23   ;;  %2801 = vst [vmem:[#allocation3 + $0x18] sm:$0xff] %v2730_v0   ;;  %v985_v18 = vadd.f32 %v983_v1, %v981_v8  ;;  %v1186_v19 = vadd.f32 %v1170_v34, %v1017_v28  ;;  %v3213_v9 = vpop.eup %3212  ;;  %v936_v24 = vadd.f32 %v4416_v40, %v916_v39  ;;  %v1314_v34 = vld [vmem:[#allocation3] sm:$0x1] }
 0x366   : > { %v1055_v25 = vmul.f32 %v4433_v10, %v1035_v16  ;;  %v1171_v11 = vmul.f32 %v4438_v51, %v1035_v16  ;;  %v898_v44 = vmul.f32 %v3213_v9, %v4385_v6 }
 0x367   : > { %v990_v15 = vmul.f32 %v989_v13, %v985_v18  ;;  %v1001_v22 = vrot.slane %v936_v24, 7 }
 0x368   : > { %v1071_v45 = vadd.f32 %v1055_v25, %v1016_v2  ;;  %v1187_v20 = vadd.f32 %v1171_v11, %v1016_v2  ;;  %v918_v32 = vmul.f32 %v4409_v49, %v898_v44 }
 0x369   : > { %v1275_v60 = vrot.slane %v990_v15, 7  ;;  %v1015_v61 = vsel %vm1009_vm1, %v1000_v58, %v1001_v22 }
 0x36a   : > { %v2695_v53 = vpack.c.bf16 %v1071_v45, %v1070_v33  ;;  %v2735_v12 = vpack.c.bf16 %v1187_v20, %v1186_v19  ;;  %v3215_v26 = vpop.eup %3214  ;;  %v1036_v31 = vsub.f32 %v936_v24, %v1015_v61 }
 0x36b   : > { %v1277_v46 = vsub.f32 %v4427_v7, %v1275_v60  ;;  %v900_v52 = vmul.f32 %v3215_v26, %v4394_v5 }
 0x36c   : > { %2795 = vst [vmem:[#allocation2 + $0x20] sm:$0xff] %v2695_v53   ;;  %2802 = vst [vmem:[#allocation3 + $0x20] sm:$0xff] %v2735_v12   ;;  %v1056_v17 = vmul.f32 %v4433_v10, %v1036_v31  ;;  %v1172_v3 = vmul.f32 %v4438_v51, %v1036_v31 }
 0x36d   : > { %v1278_v30 = vmul.f32 %v1277_v46, %v4422_v57  ;;  %v1299_v35 = vmul.f32 %v1277_v46, %v4424_v4  ;;  %v920_v28 = vmul.f32 %v4409_v49, %v900_v52  ;;  %v938_v4 = vadd.f32 %v4416_v40, %v918_v32 }
 0x36e   : > { %v1072_v13 = vadd.f32 %v1056_v17, %v1015_v61  ;;  %v1188_v18 = vadd.f32 %v1172_v3, %v1015_v61 }
 0x36f   : > { %v3217_v59 = vpop.eup %3216  ;;  %v1280_v27 = vrot.slane %v1278_v30, 1  ;;  %v1301_v43 = vrot.slane %v1299_v35, 1  ;;  %v940_v6 = vadd.f32 %v4416_v40, %v920_v28  ;;  %v1003_v23 = vrot.slane %v938_v4, 7 }
 0x370   : > { %v897_v7 = vmul.f32 %v3217_v59, %v4388_v63 }
 0x371   : > { %v1282_v41 = vadd.f32 %v1280_v27, %v990_v15  ;;  %v1303_v5 = vadd.f32 %v1301_v43, %v990_v15  ;;  %v1005_v21 = vrot.slane %v940_v6, 7  ;;  %v3219_v57 = vpop.eup %3218 }
 0x372   : > { %v917_v29 = vmul.f32 %v4409_v49, %v897_v7  ;;  %v899_v55 = vmul.f32 %v3219_v57, %v4397_v14 }
 0x373   : > { %v2654_v48 = vpack.c.bf16 %v1282_v41, %v1282_v41  ;;  %v2655_v50 = vpack.c.bf16 %v1303_v5, %v1303_v5  ;;  %v1010_v63 = vsel %vm1009_vm1, %v1005_v21, %v1006_v54 }
 0x374   : > { %v937_v42 = vadd.f32 %v4416_v40, %v917_v29  ;;  %v919_v38 = vmul.f32 %v4409_v49, %v899_v55  ;;  %v1041_v16 = vsub.f32 %v4444_v47, %v1010_v63 }
 0x375   : > { %v1288_v58 = vshrl.u32 %v2654_v48, 16  ;;  %v1309_v36 = vshrl.u32 %v2655_v50, 16 }
 0x376   : > { %v1002_v0 = vrot.slane %v937_v42, 7  ;;  %v939_v1 = vadd.f32 %v4416_v40, %v919_v38  ;;  %v1061_v47 = vmul.f32 %v4433_v10, %v1041_v16  ;;  %v1177_v19 = vmul.f32 %v4438_v51, %v1041_v16 }
 0x377   : > { %v2555_v2 = vrot.slane %v1288_v58, 11  ;;  %v2557_v14 = vrot.slane %v1309_v36, 11 }
 0x378   : > { %v1013_v54 = vsel %vm1009_vm1, %v1002_v0, %v1003_v23  ;;  %v1014_v49 = vsel %vm1009_vm1, %v1001_v22, %v1002_v0  ;;  %v1004_v11 = vrot.slane %v939_v1, 7  ;;  %v1077_v37 = vadd.f32 %v1061_v47, %v1010_v63 }
 0x379   : > { %v1297_v56 = vsel %vm1295_vm4, %v2555_v2, %v1296_v62  ;;  %v1315_v39 = vsel %vm1295_vm4, %v2557_v14, %v1314_v34  ;;  %v1037_v8 = vsub.f32 %v937_v42, %v1014_v49  ;;  %v1038_v25 = vsub.f32 %v938_v4, %v1013_v54 }
 0x37a   : > { %1298 = vst [vmem:[#allocation2] sm:$0x1] %v1297_v56  ;;  %1316 = vst [vmem:[#allocation3] sm:$0x1] %v1315_v39  ;;  %v1011_v45 = vsel %vm1009_vm1, %v1004_v11, %v1005_v21  ;;  %v1012_v20 = vsel %vm1009_vm1, %v1003_v23, %v1004_v11  ;;  %v1193_v35 = vadd.f32 %v1177_v19, %v1010_v63 }
 0x37b   : > { %v1057_v40 = vmul.f32 %v4433_v10, %v1037_v8  ;;  %v1173_v33 = vmul.f32 %v4438_v51, %v1037_v8  ;;  %v1058_v9 = vmul.f32 %v4433_v10, %v1038_v25  ;;  %v1174_v15 = vmul.f32 %v4438_v51, %v1038_v25 }
 0x37c   : > { %v1039_v12 = vsub.f32 %v939_v1, %v1012_v20  ;;  %v1040_v60 = vsub.f32 %v940_v6, %v1011_v45 }
 0x37d   : > { %v1073_v24 = vadd.f32 %v1057_v40, %v1014_v49  ;;  %v1189_v53 = vadd.f32 %v1173_v33, %v1014_v49  ;;  %v1074_v28 = vadd.f32 %v1058_v9, %v1013_v54  ;;  %v1190_v32 = vadd.f32 %v1174_v15, %v1013_v54 }
 0x37e   : > { %v1059_v22 = vmul.f32 %v4433_v10, %v1039_v12  ;;  %v1060_v46 = vmul.f32 %v4433_v10, %v1040_v60  ;;  %v1175_v52 = vmul.f32 %v4438_v51, %v1039_v12  ;;  %v1176_v30 = vmul.f32 %v4438_v51, %v1040_v60 }
 0x37f   : > { %v2700_v26 = vpack.c.bf16 %v1073_v24, %v1072_v13  ;;  %v2740_v44 = vpack.c.bf16 %v1189_v53, %v1188_v18 }
 0x380   : > { %v1075_v59 = vadd.f32 %v1059_v22, %v1012_v20  ;;  %v1076_v61 = vadd.f32 %v1060_v46, %v1011_v45  ;;  %v1191_v27 = vadd.f32 %v1175_v52, %v1012_v20  ;;  %v1192_v43 = vadd.f32 %v1176_v30, %v1011_v45 }
 0x381   : > { %2796 = vst [vmem:[#allocation2 + $0x28] sm:$0xff] %v2700_v26   ;;  %2803 = vst [vmem:[#allocation3 + $0x28] sm:$0xff] %v2740_v44  }
 0x382   : > { %v2705_v6 = vpack.c.bf16 %v1075_v59, %v1074_v28  ;;  %v2710_v7 = vpack.c.bf16 %v1077_v37, %v1076_v61  ;;  %v2745_v41 = vpack.c.bf16 %v1191_v27, %v1190_v32  ;;  %v2750_v5 = vpack.c.bf16 %v1193_v35, %v1192_v43 }
 0x384   : > { %2797 = vst [vmem:[#allocation2 + $0x30] sm:$0xff] %v2705_v6   ;;  %2798 = vst [vmem:[#allocation2 + $0x38] sm:$0xff] %v2710_v7  }
 0x385   : > { %2804 = vst [vmem:[#allocation3 + $0x30] sm:$0xff] %v2745_v41   ;;  %2805 = vst [vmem:[#allocation3 + $0x38] sm:$0xff] %v2750_v5  }
 0x386 PF: > { %v3220_v10 = vld [vmem:[%s4057_s8 + $0x38] sm:$0xff]   ;;  %v3221_v51 = vld [vmem:[%s4057_s8 + $0x30] sm:$0xff]   ;;  %v3222_v21 = vld [vmem:[%s4057_s8 + $0x28] sm:$0xff]   ;;  %s4899_s11 = sld [smem:[#allocation26_spill]] }
 0x387   : > { %2893 = vmatprep.subr.bf16.mxu1 %v3220_v10  ;;  %v3223_v57 = vld [vmem:[%s4057_s8 + $0x20] sm:$0xff]   ;;  %v3228_v31 = vld [vmem:[#allocation3] sm:$0xff]   ;;  %v3230_v4 = vld [vmem:[%s4051_s18 + $0x38] sm:$0xff]  }
 0x388   : > { %2894 = vmatpush3.bf16.msra.mxu1 %v3220_v10  ;;  %2909 = vmatprep.mubr.bf16.mxu1 %v3228_v31  ;;  %v3224_v29 = vld [vmem:[%s4057_s8 + $0x18] sm:$0xff]   ;;  %v3233_v48 = vld [vmem:[%s4051_s18 + $0x30] sm:$0xff]   ;;  %v3234_v50 = vld [vmem:[%s4051_s18 + $0x28] sm:$0xff]  }
 0x389   : > { %2895 = vmatprep.subr.bf16.mxu1 %v3221_v51  ;;  %2861 = vmatprep.subr.bf16.mxu0 %v3230_v4  ;;  %v3225_v55 = vld [vmem:[%s4057_s8 + $0x10] sm:$0xff]   ;;  %v3237_v42 = vld [vmem:[%s4051_s18 + $0x20] sm:$0xff]   ;;  %v3226_v58 = vld [vmem:[%s4057_s8 + $0x8] sm:$0xff]  }
 0x38a   : > { %2862 = vmatpush3.bf16.msra.mxu0 %v3230_v4  ;;  %v3238_v36 = vld [vmem:[%s4051_s18 + $0x18] sm:$0xff]   ;;  %v3227_v63 = vld [vmem:[%s4057_s8] sm:$0xff]   ;;  %v3244_v38 = vld [vmem:[#allocation2] sm:$0xff]  }
 0x38b   : > { %2863 = vmatprep.subr.bf16.mxu0 %v3233_v48  ;;  %v3241_v17 = vld [vmem:[%s4051_s18 + $0x10] sm:$0xff]   ;;  %2877 = vmatprep.mubr.bf16.mxu0 %v3244_v38  ;;  %v3242_v0 = vld [vmem:[%s4051_s18 + $0x8] sm:$0xff]   ;;  %v3231_v3 = vld [vmem:[#allocation3 + $0x10] sm:$0xff]  }
 0x38c   : > { %2896 = vmatpush3.bf16.msra.mxu1 %v3221_v51  ;;  %v3229_v23 = vld [vmem:[#allocation3 + $0x8] sm:$0xff]   ;;  %v3243_v2 = vld [vmem:[%s4051_s18] sm:$0xff]   ;;  %v3235_v1 = vld [vmem:[#allocation3 + $0x20] sm:$0xff]   ;;  %p2598_p13 = scmp.ne.s32.totalorder %s4899_s11, 1 }
 0x38d   : > { %2897 = vmatprep.subr.bf16.mxu1 %v3222_v21  ;;  %v3232_v14 = vld [vmem:[#allocation3 + $0x18] sm:$0xff]   ;;  %v3245_v62 = vld [vmem:[#allocation2 + $0x8] sm:$0xff]   ;;  %v3246_v34 = vld [vmem:[#allocation2 + $0x10] sm:$0xff]  }
 0x38e   : > { %2864 = vmatpush3.bf16.msra.mxu0 %v3233_v48  ;;  %v3236_v16 = vld [vmem:[#allocation3 + $0x28] sm:$0xff]   ;;  %v3239_v54 = vld [vmem:[#allocation3 + $0x30] sm:$0xff]   ;;  %v3247_v49 = vld [vmem:[#allocation2 + $0x18] sm:$0xff]  }
 0x38f   : > { %2865 = vmatprep.subr.bf16.mxu0 %v3234_v50  ;;  %v3248_v56 = vld [vmem:[#allocation2 + $0x20] sm:$0xff]   ;;  %v3240_v39 = vld [vmem:[#allocation3 + $0x38] sm:$0xff]   ;;  %v3249_v8 = vld [vmem:[#allocation2 + $0x28] sm:$0xff]  }
 0x390   : > { %2898 = vmatpush3.bf16.msra.mxu1 %v3222_v21  ;;  %v3250_v25 = vld [vmem:[#allocation2 + $0x30] sm:$0xff]   ;;  %v3251_v11 = vld [vmem:[#allocation2 + $0x38] sm:$0xff]   ;;  %v3253_v18 = vld [vmem:[%s4059_s16 + $0x30] sm:$0xff]  }
 0x391   : > { %2899 = vmatprep.subr.bf16.mxu1 %v3223_v57  ;;  %v3252_v13 = vld [vmem:[%s4059_s16 + $0x38] sm:$0xff]   ;;  %v3254_v40 = vld [vmem:[%s4059_s16 + $0x28] sm:$0xff]   ;;  %v3255_v33 = vld [vmem:[%s4059_s16 + $0x20] sm:$0xff]  }
 0x392   : > { %2866 = vmatpush3.bf16.msra.mxu0 %v3234_v50  ;;  %v3256_v47 = vld [vmem:[%s4059_s16 + $0x18] sm:$0xff]   ;;  %v3257_v19 = vld [vmem:[%s4059_s16 + $0x10] sm:$0xff]   ;;  %v3258_v45 = vld [vmem:[%s4059_s16 + $0x8] sm:$0xff]  }
 0x393   : > { %2867 = vmatprep.subr.bf16.mxu0 %v3237_v42  ;;  %v3259_v20 = vld [vmem:[%s4059_s16] sm:$0xff]  }
 0x394   : > { %2900 = vmatpush3.bf16.msra.mxu1 %v3223_v57 }
 0x395   : > { %2901 = vmatprep.subr.bf16.mxu1 %v3224_v29 }
 0x396   : > { %2868 = vmatpush3.bf16.msra.mxu0 %v3237_v42 }
 0x397   : > { %2869 = vmatprep.subr.bf16.mxu0 %v3238_v36 }
 0x398   : > { %2902 = vmatpush3.bf16.msra.mxu1 %v3224_v29 }
 0x399   : > { %2903 = vmatprep.subr.bf16.mxu1 %v3225_v55 }
 0x39a   : > { %2870 = vmatpush3.bf16.msra.mxu0 %v3238_v36 }
 0x39b   : > { %2871 = vmatprep.subr.bf16.mxu0 %v3241_v17 }
 0x39c   : > { %2904 = vmatpush3.bf16.msra.mxu1 %v3225_v55 }
 0x39d   : > { %2905 = vmatprep.subr.bf16.mxu1 %v3226_v58 }
 0x39e   : > { %2872 = vmatpush3.bf16.msra.mxu0 %v3241_v17 }
 0x39f   : > { %2873 = vmatprep.subr.bf16.mxu0 %v3242_v0 }
 0x3a0   : > { %2906 = vmatpush3.bf16.msra.mxu1 %v3226_v58 }
 0x3a1   : > { %2907 = vmatprep.subr.bf16.mxu1 %v3227_v63 }
 0x3a2   : > { %2874 = vmatpush3.bf16.msra.mxu0 %v3242_v0 }
 0x3a3   : > { %2875 = vmatprep.subr.bf16.mxu0 %v3243_v2 }
 0x3a4   : > { %2908 = vmatpush3.bf16.msra.mxu1 %v3227_v63 }
 0x3a5   : > { %2957 = vmatprep.subr.bf16.mxu1 %v3252_v13 }
 0x3a6   : > { %2876 = vmatpush3.bf16.msra.mxu0 %v3243_v2 }
 0x3a7   : > { %2910 = vmatmul.mubr.bf16.vlgmr.msra.gmra.mxu1 %v3229_v23  ;;  %2925 = vmatprep.subr.bf16.mxu0 %v3252_v13 }
 0x3a8   : > { %2913 = vmatprep.mubr.bf16.mxu1 %v3231_v3  ;;  %2965 = vmatpush3.bf16.msra.mxu1 %v3252_v13 }
 0x3a9   : > { %2878 = vmatmul.mubr.bf16.vlgmr.msra.gmra.mxu0 %v3245_v62  ;;  %2958 = vmatprep.subr.bf16.mxu1 %v3253_v18 }
 0x3aa   : > { %2881 = vmatprep.mubr.bf16.mxu0 %v3246_v34  ;;  %2926 = vmatpush3.bf16.msra.mxu0 %v3252_v13 }
 0x3ab   : > { %2927 = vmatprep.subr.bf16.mxu0 %v3253_v18 }
 0x3ac   : > { %2966 = vmatpush3.bf16.msra.mxu1 %v3253_v18 }
 0x3ad   : > { %2959 = vmatprep.subr.bf16.mxu1 %v3254_v40 }
 0x3ae   : > { %2928 = vmatpush3.bf16.msra.mxu0 %v3253_v18 }
 0x3af   : > { %2914 = vmatmul.mubr.bf16.gmra.mxu1 %v3232_v14  ;;  %2929 = vmatprep.subr.bf16.mxu0 %v3254_v40 }
 0x3b0   : > { %2917 = vmatprep.mubr.bf16.mxu1 %v3235_v1  ;;  %2967 = vmatpush3.bf16.msra.mxu1 %v3254_v40 }
 0x3b1   : > { %2882 = vmatmul.mubr.bf16.gmra.mxu0 %v3247_v49  ;;  %2960 = vmatprep.subr.bf16.mxu1 %v3255_v33 }
 0x3b2   : > { %2885 = vmatprep.mubr.bf16.mxu0 %v3248_v56  ;;  %2930 = vmatpush3.bf16.msra.mxu0 %v3254_v40 }
 0x3b3   : > { %2931 = vmatprep.subr.bf16.mxu0 %v3255_v33 }
 0x3b4   : > { %2968 = vmatpush3.bf16.msra.mxu1 %v3255_v33 }
 0x3b5   : > { %2961 = vmatprep.subr.bf16.mxu1 %v3256_v47 }
 0x3b6   : > { %2932 = vmatpush3.bf16.msra.mxu0 %v3255_v33 }
 0x3b7   : > { %2918 = vmatmul.mubr.bf16.gmra.mxu1 %v3236_v16  ;;  %2933 = vmatprep.subr.bf16.mxu0 %v3256_v47 }
 0x3b8   : > { %2921 = vmatprep.mubr.bf16.mxu1 %v3239_v54  ;;  %2969 = vmatpush3.bf16.msra.mxu1 %v3256_v47 }
 0x3b9   : > { %2886 = vmatmul.mubr.bf16.gmra.mxu0 %v3249_v8  ;;  %2962 = vmatprep.subr.bf16.mxu1 %v3257_v19 }
 0x3ba   : > { %2889 = vmatprep.mubr.bf16.mxu0 %v3250_v25  ;;  %2934 = vmatpush3.bf16.msra.mxu0 %v3256_v47 }
 0x3bb   : > { %2935 = vmatprep.subr.bf16.mxu0 %v3257_v19 }
 0x3bc   : > { %2970 = vmatpush3.bf16.msra.mxu1 %v3257_v19 }
 0x3bd   : > { %2963 = vmatprep.subr.bf16.mxu1 %v3258_v45 }
 0x3be   : > { %2936 = vmatpush3.bf16.msra.mxu0 %v3257_v19 }
 0x3bf   : > { %2922 = vmatmul.mubr.bf16.gmra.mxu1 %v3240_v39  ;;  %2937 = vmatprep.subr.bf16.mxu0 %v3258_v45 }
 0x3c0   : > { %2971 = vmatpush3.bf16.msra.mxu1 %v3258_v45 }
 0x3c1   : > { %2890 = vmatmul.mubr.bf16.gmra.mxu0 %v3251_v11  ;;  %2964 = vmatprep.subr.bf16.mxu1 %v3259_v20 }
 0x3c2   : > { %2938 = vmatpush3.bf16.msra.mxu0 %v3258_v45 }
 0x3c3   : > { %2939 = vmatprep.subr.bf16.mxu0 %v3259_v20 }
 0x3c4   : > { %2972 = vmatpush3.bf16.msra.mxu1 %v3259_v20 }
 0x3c6   : > { %2940 = vmatpush3.bf16.msra.mxu0 %v3259_v20 }
 0x467   : > { %v4593_v9 = vpop.f32.mrf.mxu1 }
 0x468   : > { %v1785_v24 = vmin.f32 %v4593_v9, 20.0 }
 0x469   : > { %v4596_v15 = vpop.f32.mrf.mxu1  ;;  %v4617_v5 = vpop.f32.mrf.mxu0 }
 0x46a   : > { %v1803_v53 = vmul.f32 1.442695, %v1785_v24  ;;  %v1783_v12 = vmin.f32 %v4596_v15, 20.0 }
 0x46b   : > { %v4599_v60 = vpop.f32.mrf.mxu1  ;;  %v4625_v50 = vpop.f32.mrf.mxu0 }
 0x46c   : > { %3260 = vpow2.f32 %v1803_v53  ;;  %v1799_v26 = vmul.f32 1.442695, %v1783_v12  ;;  %v1786_v44 = vmin.f32 %v4599_v60, 20.0 }
 0x46d   : > { %v4602_v22 = vpop.f32.mrf.mxu1  ;;  %v4632_v14 = vpop.f32.mrf.mxu0 }
 0x46e   : > { %3262 = vpow2.f32 %v1799_v26  ;;  %v1805_v46 = vmul.f32 1.442695, %v1786_v44  ;;  %v1784_v52 = vmin.f32 %v4602_v22, 20.0 }
 0x46f   : > { %v4605_v30 = vpop.f32.mrf.mxu1  ;;  %v4640_v33 = vpop.f32.mrf.mxu0 }
 0x470   : > { %3264 = vpow2.f32 %v1805_v46  ;;  %v1801_v37 = vmul.f32 1.442695, %v1784_v52  ;;  %v1789_v35 = vmin.f32 %v4605_v30, 20.0 }
 0x471   : > { %v4608_v28 = vpop.f32.mrf.mxu1 }
 0x472   : > { %3266 = vpow2.f32 %v1801_v37  ;;  %v1811_v32 = vmul.f32 1.442695, %v1789_v35  ;;  %v1787_v59 = vmin.f32 %v4608_v28, 20.0 }
 0x473   : > { %v4611_v61 = vpop.f32.mrf.mxu1 }
 0x474   : > { %3268 = vpow2.f32 %v1811_v32  ;;  %v1807_v27 = vmul.f32 1.442695, %v1787_v59  ;;  %v1790_v43 = vmin.f32 %v4611_v61, 20.0  ;;  %v4648_v59 = vpop.f32.mrf.mxu0 }
 0x475   : > { %v4614_v6 = vpop.f32.mrf.mxu1 }
 0x476   : > { %3270 = vpow2.f32 %v1807_v27  ;;  %v1813_v7 = vmul.f32 1.442695, %v1790_v43  ;;  %v1788_v41 = vmin.f32 %v4614_v6, 20.0 }
 0x477   : > { %v4619_v10 = vpop.f32.mrf.mxu1 }
 0x478   : > { %3272 = vpow2.f32 %v1813_v7  ;;  %v1809_v51 = vmul.f32 1.442695, %v1788_v41  ;;  %v1793_v21 = vmin.f32 %v4619_v10, 20.0 }
 0x479   : > { %v3261_v57 = vpop.eup %3260  ;;  %v4622_v31 = vpop.f32.mrf.mxu1 }
 0x47a   : > { %v1833_v4 = vadd.f32 1.0, %v3261_v57  ;;  %3274 = vpow2.f32 %v1809_v51  ;;  %v1819_v29 = vmul.f32 1.442695, %v1793_v21  ;;  %v1791_v48 = vmin.f32 %v4622_v31, 20.0 }
 0x47b   : > { %v3263_v55 = vpop.eup %3262  ;;  %v4627_v42 = vpop.f32.mrf.mxu1 }
 0x47c   : > { %v1849_v58 = vmul.f32 %v1833_v4, %v1833_v4  ;;  %v1831_v36 = vadd.f32 1.0, %v3263_v55  ;;  %3276 = vpow2.f32 %v1819_v29  ;;  %v1815_v63 = vmul.f32 1.442695, %v1791_v48 }
 0x47d   : > { %v3265_v38 = vpop.eup %3264  ;;  %v1794_v17 = vmin.f32 %v4627_v42, 20.0  ;;  %v4630_v23 = vpop.f32.mrf.mxu1 }
 0x47e   : > { %v1865_v0 = vadd.f32 1.0, %v1849_v58  ;;  %v1847_v3 = vmul.f32 %v1831_v36, %v1831_v36  ;;  %v1834_v2 = vadd.f32 1.0, %v3265_v38  ;;  %3278 = vpow2.f32 %v1815_v63  ;;  %v4651_v58 = vpop.f32.mrf.mxu0 }
 0x47f   : > { %v3267_v1 = vpop.eup %3266  ;;  %v1821_v62 = vmul.f32 1.442695, %v1794_v17  ;;  %v1792_v34 = vmin.f32 %v4630_v23, 20.0  ;;  %v4635_v16 = vpop.f32.mrf.mxu1 }
 0x480   : > { %3280 = vrcp.f32 %v1865_v0  ;;  %v1863_v54 = vadd.f32 1.0, %v1847_v3  ;;  %v1850_v49 = vmul.f32 %v1834_v2, %v1834_v2  ;;  %v1832_v56 = vadd.f32 1.0, %v3267_v1 }
 0x481   : > { %v3269_v39 = vpop.eup %3268  ;;  %3282 = vpow2.f32 %v1821_v62  ;;  %v1817_v8 = vmul.f32 1.442695, %v1792_v34  ;;  %v1797_v25 = vmin.f32 %v4635_v16, 20.0  ;;  %v4638_v11 = vpop.f32.mrf.mxu1 }
 0x482   : > { %3284 = vrcp.f32 %v1863_v54  ;;  %v1866_v13 = vadd.f32 1.0, %v1850_v49  ;;  %v1848_v18 = vmul.f32 %v1832_v56, %v1832_v56  ;;  %v1837_v40 = vadd.f32 1.0, %v3269_v39  ;;  %v4653_v62 = vpop.f32.mrf.mxu0 }
 0x483   : > { %v3271_v47 = vpop.eup %3270  ;;  %3286 = vpow2.f32 %v1817_v8  ;;  %v1827_v19 = vmul.f32 1.442695, %v1797_v25  ;;  %v1795_v45 = vmin.f32 %v4638_v11, 20.0  ;;  %v4643_v20 = vpop.f32.mrf.mxu1 }
 0x484   : > { %3288 = vrcp.f32 %v1866_v13  ;;  %v1864_v24 = vadd.f32 1.0, %v1848_v18  ;;  %v1853_v53 = vmul.f32 %v1837_v40, %v1837_v40  ;;  %v1835_v12 = vadd.f32 1.0, %v3271_v47 }
 0x485   : > { %v3273_v26 = vpop.eup %3272  ;;  %3290 = vpow2.f32 %v1827_v19  ;;  %v1823_v44 = vmul.f32 1.442695, %v1795_v45  ;;  %v1798_v46 = vmin.f32 %v4643_v20, 20.0  ;;  %v4646_v52 = vpop.f32.mrf.mxu1 }
 0x486   : > { %3292 = vrcp.f32 %v1864_v24  ;;  %v1869_v37 = vadd.f32 1.0, %v1853_v53  ;;  %v1851_v35 = vmul.f32 %v1835_v12, %v1835_v12  ;;  %v1838_v32 = vadd.f32 1.0, %v3273_v26  ;;  %v4655_v45 = vpop.f32.mrf.mxu0 }
 0x487   : > { %v3275_v27 = vpop.eup %3274  ;;  %3294 = vpow2.f32 %v1823_v44  ;;  %v1829_v43 = vmul.f32 1.442695, %v1798_v46  ;;  %v1796_v7 = vmin.f32 %v4646_v52, 20.0 }
 0x488   : > { %3296 = vrcp.f32 %v1869_v37  ;;  %v1867_v41 = vadd.f32 1.0, %v1851_v35  ;;  %v1854_v51 = vmul.f32 %v1838_v32, %v1838_v32  ;;  %v1836_v21 = vadd.f32 1.0, %v3275_v27 }
 0x489   : > { %v3277_v57 = vpop.eup %3276  ;;  %3298 = vpow2.f32 %v1829_v43  ;;  %v1825_v4 = vmul.f32 1.442695, %v1796_v7 }
 0x48a   : > { %3300 = vrcp.f32 %v1867_v41  ;;  %v1870_v29 = vadd.f32 1.0, %v1854_v51  ;;  %v1852_v48 = vmul.f32 %v1836_v21, %v1836_v21  ;;  %v1841_v55 = vadd.f32 1.0, %v3277_v57 }
 0x48b   : > { %v3279_v36 = vpop.eup %3278  ;;  %3302 = vpow2.f32 %v1825_v4  ;;  %v4659_v4 = vpop.f32.mrf.mxu0 }
 0x48c   : > { %3304 = vrcp.f32 %v1870_v29  ;;  %v1868_v63 = vadd.f32 1.0, %v1852_v48  ;;  %v1857_v38 = vmul.f32 %v1841_v55, %v1841_v55  ;;  %v1839_v17 = vadd.f32 1.0, %v3279_v36 }
 0x48d   : > { %v3281_v0 = vpop.eup %3280 }
 0x48e   : > { %v3283_v3 = vpop.eup %3282  ;;  %3306 = vrcp.f32 %v1868_v63  ;;  %v1873_v2 = vadd.f32 1.0, %v1857_v38  ;;  %v1855_v1 = vmul.f32 %v1839_v17, %v1839_v17  ;;  %v1897_v56 = vmul.f32 2.0, %v3281_v0 }
 0x48f   : > { %v3285_v34 = vpop.eup %3284  ;;  %v1842_v54 = vadd.f32 1.0, %v3283_v3 }
 0x490   : > { %v3287_v49 = vpop.eup %3286  ;;  %v1895_v39 = vmul.f32 2.0, %v3285_v34  ;;  %v1871_v8 = vadd.f32 1.0, %v1855_v1  ;;  %3308 = vrcp.f32 %v1873_v2  ;;  %v1913_v46 = vsub.f32 1.0, %v1897_v56 }
 0x491   : > { %v3289_v25 = vpop.eup %3288  ;;  %v1858_v13 = vmul.f32 %v1842_v54, %v1842_v54  ;;  %v1840_v18 = vadd.f32 1.0, %v3287_v49 }
 0x492   : > { %v3291_v40 = vpop.eup %3290  ;;  %v1911_v47 = vsub.f32 1.0, %v1895_v39  ;;  %v1898_v19 = vmul.f32 2.0, %v3289_v25  ;;  %3310 = vrcp.f32 %v1871_v8  ;;  %v1929_v38 = vmul.f32 %v4593_v9, %v1913_v46  ;;  %v1527_v39 = vpop.f32.mrf.mxu0 }
 0x493   : > { %v3293_v24 = vpop.eup %3292  ;;  %v1874_v53 = vadd.f32 1.0, %v1858_v13  ;;  %v1856_v12 = vmul.f32 %v1840_v18, %v1840_v18  ;;  %v1845_v26 = vadd.f32 1.0, %v3291_v40 }
 0x494   : > { %v3295_v44 = vpop.eup %3294  ;;  %v1914_v37 = vsub.f32 1.0, %v1898_v19  ;;  %v1896_v35 = vmul.f32 2.0, %v3293_v24  ;;  %v1927_v51 = vmul.f32 %v1911_v47, %v4596_v15  ;;  %v1961_v47 = vmul.f32 %v4617_v5, %v1929_v38 }
 0x495   : > { %v3297_v32 = vpop.eup %3296  ;;  %3312 = vrcp.f32 %v1874_v53  ;;  %v1872_v27 = vadd.f32 1.0, %v1856_v12  ;;  %v1861_v43 = vmul.f32 %v1845_v26, %v1845_v26  ;;  %v1843_v7 = vadd.f32 1.0, %v3295_v44  ;;  %v2888_v44 = vpop.f32.mrf.mxu0 }
 0x496   : > { %v3299_v41 = vpop.eup %3298  ;;  %v1930_v21 = vmul.f32 %v4599_v60, %v1914_v37  ;;  %v1912_v57 = vsub.f32 1.0, %v1896_v35  ;;  %v1901_v0 = vmul.f32 2.0, %v3297_v32  ;;  %v1959_v49 = vmul.f32 %v1927_v51, %v4625_v50 }
 0x497   : > { %v3301_v29 = vpop.eup %3300  ;;  %3314 = vrcp.f32 %v1872_v27  ;;  %v1877_v48 = vadd.f32 1.0, %v1861_v43  ;;  %v1859_v55 = vmul.f32 %v1843_v7, %v1843_v7  ;;  %v1846_v36 = vadd.f32 1.0, %v3299_v41  ;;  %v1530_v43 = vpop.f32.mrf.mxu0 }
 0x498   : > { %v3303_v63 = vpop.eup %3302  ;;  %v1928_v17 = vmul.f32 %v1912_v57, %v4602_v22  ;;  %v1899_v3 = vmul.f32 2.0, %v3301_v29  ;;  %v1962_v56 = vmul.f32 %v4632_v14, %v1930_v21  ;;  %v1917_v13 = vsub.f32 1.0, %v1901_v0 }
 0x499   : > { %v3305_v2 = vpop.eup %3304  ;;  %3316 = vrcp.f32 %v1877_v48  ;;  %v1875_v15 = vadd.f32 1.0, %v1859_v55  ;;  %v1862_v1 = vmul.f32 %v1846_v36, %v1846_v36  ;;  %v1844_v60 = vadd.f32 1.0, %v3303_v63  ;;  %v2891_v36 = vpop.f32.mrf.mxu0 }
 0x49a   : > { %v1915_v34 = vsub.f32 1.0, %v1899_v3  ;;  %v1902_v54 = vmul.f32 2.0, %v3305_v2  ;;  %v1960_v22 = vmul.f32 %v1928_v17, %v4640_v33  ;;  %v1976_v26 = vpack.c.bf16 %v1962_v56, %v1961_v47 }
 0x49b   : > { %v3307_v8 = vpop.eup %3306  ;;  %3318 = vrcp.f32 %v1875_v15  ;;  %v1878_v25 = vadd.f32 1.0, %v1862_v1  ;;  %v1860_v9 = vmul.f32 %v1844_v60, %v1844_v60  ;;  %v1933_v33 = vmul.f32 %v4605_v30, %v1917_v13  ;;  %v1543_v2 = vpop.f32.mrf.mxu0 }
 0x49c   : > { %v1918_v18 = vsub.f32 1.0, %v1902_v54  ;;  %v1900_v40 = vmul.f32 2.0, %v3307_v8  ;;  %v1975_v24 = vpack.c.bf16 %v1960_v22, %v1959_v49  ;;  %v1931_v50 = vmul.f32 %v1915_v34, %v4608_v28 }
 0x49d   : > { %3320 = vrcp.f32 %v1878_v25  ;;  %v1876_v19 = vadd.f32 1.0, %v1860_v9  ;;  %v3309_v53 = vpop.eup %3308  ;;  %v1965_v21 = vmul.f32 %v4648_v59, %v1933_v33  ;;  %v2892_v9 = vpop.f32.mrf.mxu0 }
 0x49e   : > { %v1934_v14 = vmul.f32 %v4611_v61, %v1918_v18  ;;  %v1916_v12 = vsub.f32 1.0, %v1900_v40  ;;  %2941 = vmatprep.mubr.bf16.mxu0 %v1975_v24  ;;  %v1905_v5 = vmul.f32 2.0, %v3309_v53  ;;  %v1963_v27 = vmul.f32 %v1931_v50, %v4651_v58 }
 0x49f   : > { %v3311_v46 = vpop.eup %3310  ;;  %3322 = vrcp.f32 %v1876_v19  ;;  %2942 = vmatmul.mubr.bf16.vlgmr.msra.gmra.mxu0 %v1976_v26 }
 0x4a0   : > { %v1932_v37 = vmul.f32 %v1916_v12, %v4614_v6  ;;  %v1903_v35 = vmul.f32 2.0, %v3311_v46  ;;  %v1966_v28 = vmul.f32 %v4653_v62, %v1934_v14  ;;  %v1921_v30 = vsub.f32 1.0, %v1905_v5 }
 0x4a2   : > { %v3313_v32 = vpop.eup %3312  ;;  %v1964_v61 = vmul.f32 %v1932_v37, %v4655_v45  ;;  %v1919_v51 = vsub.f32 1.0, %v1903_v35  ;;  %v1978_v55 = vpack.c.bf16 %v1966_v28, %v1965_v21  ;;  %v1937_v38 = vmul.f32 %v4619_v10, %v1921_v30  ;;  %v1949_v35 = vld [vmem:[#allocation4 + $0x8] sm:$0xff] }
 0x4a3   : > { %v1906_v7 = vmul.f32 2.0, %v3313_v32 }
 0x4a4   : > { %v3315_v41 = vpop.eup %3314  ;;  %v1977_v57 = vpack.c.bf16 %v1964_v61, %v1963_v27  ;;  %v1935_v45 = vmul.f32 %v1919_v51, %v4622_v31  ;;  %v1969_v31 = vmul.f32 %v4659_v4, %v1937_v38  ;;  %v1947_v27 = vld [vmem:[#allocation4 + $0x50] sm:$0xff]  ;;  %v1948_v51 = vld [vmem:[#allocation4 + $0x68] sm:$0xff] }
 0x4a5   : > { %v1922_v29 = vsub.f32 1.0, %v1906_v7  ;;  %v1904_v6 = vmul.f32 2.0, %v3315_v41 }
 0x4a6   : > { %v3317_v48 = vpop.eup %3316  ;;  %2945 = vmatprep.mubr.bf16.mxu0 %v1977_v57  ;;  %v1967_v54 = vmul.f32 %v1935_v45, %v1527_v39  ;;  %v1546_v39 = vpop.f32.mrf.mxu0  ;;  %v1952_v45 = vld [vmem:[#allocation4 + $0x20] sm:$0xff] }
 0x4a7   : > { %v1938_v58 = vmul.f32 %v4627_v42, %v1922_v29  ;;  %v1920_v63 = vsub.f32 1.0, %v1904_v6  ;;  %2946 = vmatmul.mubr.bf16.gmra.mxu0 %v1978_v55  ;;  %v1909_v59 = vmul.f32 2.0, %v3317_v48  ;;  %v1953_v29 = vld [vmem:[#allocation4 + $0x10] sm:$0xff]  ;;  %v1951_v48 = vld [vmem:[#allocation4 + $0x40] sm:$0xff] }
 0x4a8   : > { %v3319_v62 = vpop.eup %3318 }
 0x4a9   : > { %v1936_v17 = vmul.f32 %v1920_v63, %v4630_v23  ;;  %v1907_v0 = vmul.f32 2.0, %v3319_v62  ;;  %v1970_v60 = vmul.f32 %v2888_v44, %v1938_v58  ;;  %v1925_v42 = vsub.f32 1.0, %v1909_v59  ;;  %v1946_v44 = vld [vmem:[#allocation4 + $0x18] sm:$0xff] }
 0x4aa   : > { %v3321_v3 = vpop.eup %3320  ;;  %v1954_v58 = vld [vmem:[#allocation4 + $0x38] sm:$0xff] }
 0x4ab   : > { %v1923_v15 = vsub.f32 1.0, %v1907_v0  ;;  %v1910_v1 = vmul.f32 2.0, %v3321_v3  ;;  %v1968_v49 = vmul.f32 %v1936_v17, %v1530_v43  ;;  %v1980_v13 = vpack.c.bf16 %v1970_v60, %v1969_v31  ;;  %v1950_v43 = vld [vmem:[#allocation4 + $0x48] sm:$0xff]  ;;  %v1957_v59 = vld [vmem:[#allocation4 + $0x78] sm:$0xff] }
 0x4ac   : > { %v3323_v34 = vpop.eup %3322  ;;  %v1941_v18 = vmul.f32 %v4635_v16, %v1925_v42  ;;  %v1958_v60 = vld [vmem:[#allocation4 + $0x28] sm:$0xff] }
 0x4ad   : > { %v1926_v56 = vsub.f32 1.0, %v1910_v1  ;;  %v1908_v8 = vmul.f32 2.0, %v3323_v34  ;;  %v1979_v25 = vpack.c.bf16 %v1968_v49, %v1967_v54  ;;  %v1939_v10 = vmul.f32 %v1923_v15, %v4638_v11  ;;  %v1945_v11 = vld [vmem:[#allocation4 + $0x58] sm:$0xff]  ;;  %v1956_v49 = vld [vmem:[#allocation4 + $0x70] sm:$0xff] }
 0x4ae   : > { %v1973_v53 = vmul.f32 %v2891_v36, %v1941_v18 }
 0x4af   : > { %v1942_v23 = vmul.f32 %v4643_v20, %v1926_v56  ;;  %v1924_v22 = vsub.f32 1.0, %v1908_v8  ;;  %2949 = vmatprep.mubr.bf16.mxu1 %v1979_v25  ;;  %v1971_v47 = vmul.f32 %v1939_v10, %v1543_v2  ;;  %v1943_v20 = vld [vmem:[#allocation4 + $0x30] sm:$0xff]  ;;  %v1955_v2 = vld [vmem:[#allocation4 + $0x60] sm:$0xff] }
 0x4b0   : > { %2950 = vmatmul.mubr.bf16.vlgmr.msra.gmra.mxu1 %v1980_v13 }
 0x4b1   : > { %v1940_v40 = vmul.f32 %v1924_v22, %v4646_v52  ;;  %v1974_v19 = vmul.f32 %v2892_v9, %v1942_v23  ;;  %v1944_v52 = vld [vmem:[#allocation4] sm:$0xff] }
 0x4b3   : > { %v1972_v24 = vmul.f32 %v1940_v40, %v1546_v39  ;;  %v1982_v50 = vpack.c.bf16 %v1974_v19, %v1973_v53 }
 0x4b5   : > { %v1981_v4 = vpack.c.bf16 %v1972_v24, %v1971_v47 }
 0x4b7   : > { %2953 = vmatprep.mubr.bf16.mxu1 %v1981_v4 }
 0x4b8   : > { %2954 = vmatmul.mubr.bf16.gmra.mxu1 %v1982_v50 }
 0x55f   : > { %v2943_v14 = vpop.f32.mrf.mxu0 }
 0x560   : > { %v2146_v12 = vadd.f32 %v2943_v14, %v1945_v11 }
 0x561   : > { %v2081_v26 = vpop.f32.mrf.mxu0 }
 0x562   : > { %2162 = vst [vmem:[#allocation4 + $0x58] sm:$0xff] %v2146_v12  ;;  %v2144_v16 = vadd.f32 %v2081_v26, %v1943_v20 }
 0x563   : > { %v2944_v46 = vpop.f32.mrf.mxu0 }
 0x564   : > { %2160 = vst [vmem:[#allocation4 + $0x30] sm:$0xff] %v2144_v16  ;;  %v2147_v33 = vadd.f32 %v2944_v46, %v1946_v44 }
 0x565   : > { %v2084_v37 = vpop.f32.mrf.mxu0 }
 0x566   : > { %2163 = vst [vmem:[#allocation4 + $0x18] sm:$0xff] %v2147_v33  ;;  %v2145_v5 = vadd.f32 %v2084_v37, %v1944_v52 }
 0x567   : > { %v2947_v32 = vpop.f32.mrf.mxu0 }
 0x568   : > { %2161 = vst [vmem:[#allocation4] sm:$0xff] %v2145_v5  ;;  %v2150_v28 = vadd.f32 %v2947_v32, %v1949_v35 }
 0x569   : > { %v2097_v61 = vpop.f32.mrf.mxu0 }
 0x56a   : > { %2166 = vst [vmem:[#allocation4 + $0x8] sm:$0xff] %v2150_v28  ;;  %v2148_v7 = vadd.f32 %v2097_v61, %v1947_v27 }
 0x56b   : > { %v2948_v41 = vpop.f32.mrf.mxu0 }
 0x56c   : > { %2164 = vst [vmem:[#allocation4 + $0x50] sm:$0xff] %v2148_v7  ;;  %v2151_v21 = vadd.f32 %v2948_v41, %v1950_v43 }
 0x56d   : > { %v2100_v57 = vpop.f32.mrf.mxu0 }
 0x56e   : > { %2167 = vst [vmem:[#allocation4 + $0x48] sm:$0xff] %v2151_v21  ;;  %v2149_v30 = vadd.f32 %v2100_v57, %v1948_v51 }
 0x570   : > { %2165 = vst [vmem:[#allocation4 + $0x68] sm:$0xff] %v2149_v30  ;;  %v2951_v6 = vpop.f32.mrf.mxu1 }
 0x571   : > { %v2154_v55 = vadd.f32 %v2951_v6, %v1953_v29 }
 0x572   : > { %v2113_v36 = vpop.f32.mrf.mxu1 }
 0x573   : > { %2170 = vst [vmem:[#allocation4 + $0x10] sm:$0xff] %v2154_v55  ;;  %v2152_v63 = vadd.f32 %v2113_v36, %v1951_v48 }
 0x574   : > { %v2952_v62 = vpop.f32.mrf.mxu1 }
 0x575   : > { %2168 = vst [vmem:[#allocation4 + $0x40] sm:$0xff] %v2152_v63  ;;  %v2155_v38 = vadd.f32 %v2952_v62, %v1954_v58 }
 0x576   : > { %v2116_v17 = vpop.f32.mrf.mxu1 }
 0x577   : > { %2171 = vst [vmem:[#allocation4 + $0x38] sm:$0xff] %v2155_v38  ;;  %v2153_v0 = vadd.f32 %v2116_v17, %v1952_v45 }
 0x578   : > { %v2955_v3 = vpop.f32.mrf.mxu1 }
 0x579   : > { %2169 = vst [vmem:[#allocation4 + $0x20] sm:$0xff] %v2153_v0  ;;  %v2158_v15 = vadd.f32 %v2955_v3, %v1957_v59 }
 0x57a   : > { %v2129_v1 = vpop.f32.mrf.mxu1 }
 0x57b   : > { %2174 = vst [vmem:[#allocation4 + $0x78] sm:$0xff] %v2158_v15  ;;  %v2156_v34 = vadd.f32 %v2129_v1, %v1955_v2 }
 0x57c   : > { %v2956_v54 = vpop.f32.mrf.mxu1 }
 0x57d   : > { %2172 = vst [vmem:[#allocation4 + $0x60] sm:$0xff] %v2156_v34  ;;  %v2159_v42 = vadd.f32 %v2956_v54, %v1958_v60  ;;  %2179 = sbr.rel (%p2598_p13) target bundleno = 1420 (0x58c), region = 76 }
 0x57e   : > { %v2132_v56 = vpop.f32.mrf.mxu1 }
 0x57f   : > { %2175 = vst [vmem:[#allocation4 + $0x28] sm:$0xff] %v2159_v42  ;;  %v2157_v8 = vadd.f32 %v2132_v56, %v1956_v49 }
 0x581   : > { %2173 = vst [vmem:[#allocation4 + $0x70] sm:$0xff] %v2157_v8 }
 0x582   : > { %v2180_v31 = vld [vmem:[#allocation4 + $0x30] sm:$0xff]  ;;  %v2181_v25 = vld [vmem:[#allocation4] sm:$0xff]  ;;  %v2182_v9 = vld [vmem:[#allocation4 + $0x58] sm:$0xff] }
 0x583   : > { %v2755_v10 = vpack.c.bf16 %v2181_v25, %v2180_v31  ;;  %v2183_v23 = vld [vmem:[#allocation4 + $0x18] sm:$0xff]  ;;  %v2184_v22 = vld [vmem:[#allocation4 + $0x50] sm:$0xff]  ;;  %v2185_v13 = vld [vmem:[#allocation4 + $0x68] sm:$0xff] }
 0x584   : > { %v2760_v18 = vpack.c.bf16 %v2183_v23, %v2182_v9  ;;  %v2765_v40 = vpack.c.bf16 %v2185_v13, %v2184_v22  ;;  %v2186_v39 = vld [vmem:[#allocation4 + $0x8] sm:$0xff]  ;;  %v2188_v19 = vld [vmem:[#allocation4 + $0x40] sm:$0xff]  ;;  %v2190_v4 = vld [vmem:[#allocation4 + $0x10] sm:$0xff] }
 0x585   : > { %v2187_v47 = vld [vmem:[#allocation4 + $0x48] sm:$0xff]  ;;  %2756 = vst [vmem:[%s4066_s30] sm:$0xff] %v2755_v10   ;;  %v2189_v53 = vld [vmem:[#allocation4 + $0x20] sm:$0xff]  ;;  %v2191_v50 = vld [vmem:[#allocation4 + $0x38] sm:$0xff] }
 0x586   : > { %v2770_v24 = vpack.c.bf16 %v2187_v47, %v2186_v39  ;;  %2806 = vst [vmem:[%s4066_s30 + $0x8] sm:$0xff] %v2760_v18   ;;  %2807 = vst [vmem:[%s4066_s30 + $0x10] sm:$0xff] %v2765_v40   ;;  %v2775_v11 = vpack.c.bf16 %v2189_v53, %v2188_v19  ;;  %v2780_v14 = vpack.c.bf16 %v2191_v50, %v2190_v4  ;;  %v2192_v20 = vld [vmem:[#allocation4 + $0x60] sm:$0xff]  ;;  %v2194_v26 = vld [vmem:[#allocation4 + $0x78] sm:$0xff] }
 0x587   : > { %v2195_v16 = vld [vmem:[#allocation4 + $0x28] sm:$0xff] }
 0x588   : > { %v2193_v12 = vld [vmem:[#allocation4 + $0x70] sm:$0xff]  ;;  %2808 = vst [vmem:[%s4066_s30 + $0x18] sm:$0xff] %v2770_v24   ;;  %2809 = vst [vmem:[%s4066_s30 + $0x20] sm:$0xff] %v2775_v11   ;;  %v2790_v46 = vpack.c.bf16 %v2195_v16, %v2194_v26 }
 0x589   : > { %v2785_v44 = vpack.c.bf16 %v2193_v12, %v2192_v20  ;;  %2810 = vst [vmem:[%s4066_s30 + $0x28] sm:$0xff] %v2780_v14  }
 0x58a   : > { %2812 = vst [vmem:[%s4066_s30 + $0x38] sm:$0xff] %v2790_v46  }
 0x58b   : > { %2811 = vst [vmem:[%s4066_s30 + $0x30] sm:$0xff] %v2785_v44  }
 0x58c PF: > { %s4900_s14 = sld [smem:[#allocation27_spill]]  ;;  %s2292_s15 = sshll.u32 %s4066_s30, 4  ;;  %s4696_s15 = int_to_ptr.vmem [resolvable:$true] %s2292_s15 }
 0x58d   : > { %s4901_s19 = sld [smem:[#allocation28_spill]]  ;;  %s2277_s17 = scalar_lea.sflag [#allocation7], %s4030_s2 }
 0x58e   : > { %s4902_s27 = sld [smem:[#allocation38_spill]]  ;;  %s3490_s16 = scalar_lea.vmem %s4696_s15, 1024 }
 0x58f   : > { %s4903_s21 = sld [smem:[#allocation47_spill]]  ;;  %p3491_p6 = scmp.ne.s32.totalorder %s4696_s15, %s3490_s16 }
 0x590   : > { %s3678_s13 = smov [#allocation16]  }
 0x591   : > { %s3494_s30 = sshll.u32 %s3678_s13, 4  ;;  %s3495_s30 = int_to_ptr.vmem [resolvable:$false] %s3494_s30 }
 0x592   : > { %s2616_s10 = sshll.u32 %s4900_s14, 4  ;;  %s3496_s3 = scalar_lea.vmem %s3495_s30, 2048 }
 0x593   : > { %s2617_s22 = sshll.u32 %s4901_s19, 5  ;;  %p3497_p9 = scmp.lt.s32.totalorder %s4696_s15, %s3495_s30 }
 0x594   : > { %s2289_s24 = sadd.s32 %s2617_s22, %s2616_s10  ;;  %p4905_p3 = scmp.ne.s32.totalorder %s4902_s27, 0 }
 0x595   : > { %s2618_s4 = sshll.u32 %s2289_s24, 6  ;;  %s4904_s18 = smov %s4903_s21 }
 0x596   : > { %s4701_s8 = scalar_lea.hbm %s4903_s21, %s2618_s4  ;;  %p3492_p2 = pnand %p3491_p6, %p4905_p3 }
 0x597   : > { %p3498_p5 = scmp.lt.s32.totalorder %s3496_s3, %s3490_s16 }
 0x598   : > { %p3493_p1 = pneg %p3492_p2 }
 0x599   : > { %p3499_p0 = por %p3498_p5, %p3497_p9 }
 0x59b   : > { %p3500_p10 = pnand %p3499_p0, %p3493_p1 }
 0x59d   : > { %3503 = shalt.err (!%p3500_p10)
}
 0x59e   : > { %s3504_s7 = scalar_lea.hbm %s4701_s8, 1024  ;;  %s3508_s11 = scalar_lea.hbm %s4904_s18, 4096 }
 0x59f   : > { %p3505_p12 = scmp.ne.s32.totalorder %s4701_s8, %s3504_s7  ;;  %p3509_p11 = scmp.lt.s32.totalorder %s4701_s8, %s4904_s18 }
 0x5a0   : > { %p3510_p4 = scmp.lt.s32.totalorder %s3508_s11, %s3504_s7 }
 0x5a1   : > { %p3506_p7 = pnand %p3505_p12, %p4905_p3 }
 0x5a2   : > { %p3511_p13 = por %p3510_p4, %p3509_p11 }
 0x5a3   : > { %p3507_p8 = pneg %p3506_p7 }
 0x5a5   : > { %p3512_p6 = pnand %p3511_p13, %p3507_p8 }
 0x5a7   : > { %3515 = shalt.err (!%p3512_p6)
}
 0x5a8   : > { %s3679_s10 = smov 64   ;;  %s3680_s22 = smov 4  }
 0x5a9   : > { %2987 = dma.vmem_to_hbm [thread:$0]  (%p4905_p3), %s4696_s15, 1024, %s4701_s8, %s2277_s17, %s3679_s10, %s3679_s10, %s3680_s22  }
 0x5aa PF: > { %s4906_s24 = sld [smem:[#allocation25_spill]]  ;;  %p3016_p2 = scmp.ge.s32.totalorder %s3666_s12, 2 }
 0x5ab   : > { %s4907_s4 = sld [smem:[#allocation33_spill]] }
 0x5b0   : > { %s2307_s23 = sand.u32 1, %s4906_s24  }
 0x5b1   : > { %p4908_p1 = scmp.ne.s32.totalorder %s4907_s4, 0  ;;  %s2308_s20 = scalar_lea.sflag [#allocation7], %s2307_s23 }
 0x5b3   : > { %p3010_p9 = pnand %p3016_p2, %p4908_p1 }
 0x5b5   : > { %p3011_p5 = pneg %p3010_p9 }
 0x5b7   : > { %3601 = dma.done.wait (%p3011_p5), %s2308_s20, 1024  }
 0x5b8   : > { %3603 = vsyncadd (%p3011_p5), %s2308_s20, 4294966272  ;;  %s31_s12 = sadd.s32 1, %s3666_s12   ;;  %s4911_s21 = sld [smem:[#allocation23_spill]] }
 0x5b9   : > { %p4731_p0 = scmp.ge.s32.totalorder %s31_s12, 10   ;;  %s4912_s22 = sld [smem:[#allocation24_spill]] }
 0x5ba   : > { %s4913_s23 = sld [smem:[#allocation36_spill]]  ;;  %s4919_s24 = smov %s3622_s25 }
 0x5bb   : > { %s4914_s7 = sld [smem:[#allocation29_spill]]  ;;  %s4920_s25 = smov %s3626_s26 }
 0x5bc   : > { %s4915_s8 = sld [smem:[#allocation30_spill]]  ;;  %s4921_s26 = smov %s3979_s0 }
 0x5bd   : > { %s4916_s2 = sld [smem:[#allocation35_spill]]  ;;  %s4922_s27 = smov %s3634_s28 }
 0x5be   : > { %s4917_s10 = sld [smem:[#allocation39_spill]]  ;;  %s4923_s28 = smov %s3638_s29 }
 0x5bf   : > { %s4918_s11 = sld [smem:[#allocation40_spill]]  ;;  %s4924_s29 = smov %s3976_s1 }
 0x5c0   : > { %s4925_s30 = smov %s3654_s9  ;;  %30 = sbr.rel (!%p4731_p0) target bundleno = 25 (0x19), region = 151 }
 0x5c3   : > { %s4926_s9 = smov %s4916_s2 }
 0x5c5   :  { %2313 = vsyncpa [#allocation6], 1 }
 0x5c6   :  { %2315 = vsyncpa [#allocation6 + $0x1], 1 }
 0x5c7   :  { %2316 = vsyncpa [#allocation9], 1 }
 0x5c8   :  { %2318 = vsyncpa [#allocation9 + $0x1], 1 }
 0x5c9   :  { %2319 = vsyncpa [#allocation12], 1 }
 0x5ca   :  { %2321 = vsyncpa [#allocation12 + $0x1], 1 }
 0x5cb   :  { %2322 = vsyncpa [#allocation15], 1 }
 0x5cc   :  { %2324 = vsyncpa [#allocation15 + $0x1], 1 }
 0x5cd   :  { %2325 = vsyncpa [#allocation7], 1 }
 0x5ce   :  { %2327 = vsyncpa [#allocation7 + $0x1], 1 }

</bundles_post_ra>
